<compile_context>
chip_gen: v7x
topology: tpu7x:2x2x1
jax: 0.10.0
libtpu: 0.0.40
codegen_flags: <defaults>
</compile_context>

<pallas_src>
import math

import numpy as np
import jax
import jax.numpy as jnp
from jax import lax
from jax.experimental import pallas as pl
from jax.experimental.pallas import tpu as pltpu


_NEG_BIG = -1e30  # finite "minus infinity": robust against inf - inf = NaN


def _round_up(x, m):
    return ((x + m - 1) // m) * m


def _default_tk():
    """256-wide kv tiles on v6e/v7x (2x256^2 MXU), 128 elsewhere (v5e 4x128^2)."""
    try:
        kind = jax.devices()[0].device_kind.lower()
    except Exception:
        return 128
    if "v6" in kind or "v7" in kind:
        return 256
    return 128


def _qkv_proj_kernel(x_ref, w_ref, o_ref):
    # x: (tm, d_in_p), w: (d_in_p, tn) -> o: (tm, tn); f32 accumulation.
    o_ref[...] = jnp.dot(
        x_ref[...], w_ref[...], preferred_element_type=jnp.float32
    ).astype(o_ref.dtype)


def _make_flash_causal_kernel(tq, tk):
    def kernel(q_ref, k_ref, v_ref, o_ref, m_sc, l_sc, acc_sc):
        # q_ref: (tq, d_p), k_ref / v_ref: (tk, d_p), o_ref: (tq, d_p)
        i = pl.program_id(1)  # query-tile index
        j = pl.program_id(2)  # kv-tile index (innermost, "arbitrary")
        q_start = i * tq
        kv_start = j * tk

        @pl.when(j == 0)
        def _init():
            m_sc[...] = jnp.full(m_sc.shape, _NEG_BIG, m_sc.dtype)
            l_sc[...] = jnp.zeros_like(l_sc)
            acc_sc[...] = jnp.zeros_like(acc_sc)

        # Causal block classification:
        #   fully masked   <=> smallest col >  largest row  <=> kv_start >= q_start + tq
        #   needs iota mask<=> largest col  >  smallest row <=> kv_start + tk - 1 > q_start
        not_fully_masked = kv_start < q_start + tq
        needs_mask = kv_start + tk > q_start + 1

        # exp / PV-matmul dtype: bf16 when v is bf16 (packs 2/lane on v6e/v7x),
        # f32 otherwise. m/l/acc always stay f32.
        p_dtype = jnp.bfloat16 if v_ref.dtype == jnp.bfloat16 else jnp.float32

        def process(apply_mask):
            # Scores: contract the last dims directly (no explicit k.T relayout).
            s = lax.dot_general(
                q_ref[...], k_ref[...],
                dimension_numbers=(((1,), (1,)), ((), ())),
                preferred_element_type=jnp.float32,
            )  # (tq, tk); already scaled (1/sqrt(d_out) folded into W_query)
            if apply_mask:
                row = q_start + lax.broadcasted_iota(jnp.int32, s.shape, 0)
                col = kv_start + lax.broadcasted_iota(jnp.int32, s.shape, 1)
                s = jnp.where(col > row, jnp.float32(_NEG_BIG), s)

            m_prev = m_sc[...]                            # (tq, d_p) lane-dense
            row_max = s.max(axis=-1, keepdims=True)       # (tq, 1)
            m_new = jnp.maximum(m_prev, row_max)          # (tq, d_p) lane-dense
            m_col = jnp.maximum(m_prev[:, :1], row_max)   # (tq, 1) for s broadcast
            alpha = jnp.exp(m_prev - m_new)               # (tq, d_p)

            p = jnp.exp((s - m_col).astype(p_dtype))      # (tq, tk)
            p_sum = jnp.sum(p, axis=-1, keepdims=True, dtype=jnp.float32)

            l_sc[...] = alpha * l_sc[...] + p_sum
            acc_sc[...] = alpha * acc_sc[...] + jnp.dot(
                p, v_ref[...], preferred_element_type=jnp.float32)
            m_sc[...] = m_new

        @pl.when(jnp.logical_and(not_fully_masked, needs_mask))
        def _diagonal_block():
            process(apply_mask=True)

        @pl.when(jnp.logical_and(not_fully_masked, jnp.logical_not(needs_mask)))
        def _unmasked_block():
            process(apply_mask=False)

        @pl.when(j == pl.num_programs(2) - 1)
        def _finalize():
            # Exact division: runs once per q tile, so it costs nothing and
            # avoids the approx-reciprocal error.
            o_ref[...] = (acc_sc[...] / l_sc[...]).astype(o_ref.dtype)

    return kernel


def causal_attention(x, w_query, w_key, w_value, *,
                     tq=256, tk=None, tm=512, qkv_dtype=None):
    """x: (B, T, d_in); w_*: (d_in, d_out). Returns (B, T, d_out).

    Eval-mode CausalAttention forward (dropout = identity).
    """
    B, T, d_in = x.shape
    d_out = w_query.shape[1]
    out_dtype = x.dtype
    if tk is None:
        tk = _default_tk()
    if qkv_dtype is None:
        # bf16 intermediate halves kernel-1 writes and kernel-2 K/V re-reads;
        # f32 accumulation is kept inside both kernels.
        qkv_dtype = jnp.bfloat16 if out_dtype == jnp.float32 else out_dtype

    # Pad to MXU/lane-friendly sizes (exact, see header comment).  T is padded
    # to lcm(tq, tk) so both the q and kv grids divide exactly.
    d_in_p = _round_up(d_in, 128)
    d_p = _round_up(d_out, 128)
    tile_lcm = tq * tk // math.gcd(tq, tk)
    Tp = _round_up(T, tile_lcm)
    assert Tp % tq == 0 and Tp % tk == 0

    # Fold 1/sqrt(d_out) into W_query: O(d_in*d_out) instead of O(T^2) scaling.
    scale = 1.0 / math.sqrt(d_out)

    def _pad_w(w, pre_scale=None):
        w = w.astype(jnp.float32)
        if pre_scale is not None:
            w = w * pre_scale
        return jnp.pad(w, ((0, d_in_p - d_in), (0, d_p - d_out)))

    wqkv = jnp.concatenate(
        [_pad_w(w_query, scale), _pad_w(w_key), _pad_w(w_value)], axis=1
    ).astype(x.dtype)  # (d_in_p, 3*d_p)

    x_p = jnp.pad(x, ((0, 0), (0, Tp - T), (0, d_in_p - d_in)))
    Mp = B * Tp
    Mp_pad = _round_up(Mp, tm)          # no silent row drop when raising tm
    x2 = x_p.reshape(Mp, d_in_p)
    if Mp_pad != Mp:
        x2 = jnp.pad(x2, ((0, Mp_pad - Mp), (0, 0)))

    # N-tile the fused weight once it exceeds a few MiB so it never has to be
    # fully resident (v7x: 64 MiB physical / 32 MiB scoped VMEM).
    n_total = 3 * d_p
    w_itemsize = np.dtype(wqkv.dtype).itemsize
    w_budget = 4 * 1024 * 1024
    tn = n_total
    if d_in_p * tn * w_itemsize > w_budget:
        tn = d_p
        while tn % 256 == 0 and d_in_p * tn * w_itemsize > w_budget:
            tn //= 2
    assert n_total % tn == 0 and tn % 128 == 0

    # ---- kernel 1: fused QKV projection -------------------------------------
    qkv = pl.pallas_call(
        _qkv_proj_kernel,
        out_shape=jax.ShapeDtypeStruct((Mp_pad, n_total), qkv_dtype),
        grid_spec=pltpu.PrefetchScalarGridSpec(
            num_scalar_prefetch=0,
            grid=(Mp_pad // tm, n_total // tn),
            in_specs=[
                # x block constant across the (inner) n axis -> DMA elided.
                pl.BlockSpec((tm, d_in_p), lambda m, n: (m, 0)),
                pl.BlockSpec((d_in_p, tn), lambda m, n: (0, n)),
            ],
            out_specs=pl.BlockSpec((tm, tn), lambda m, n: (m, n)),
        ),
        compiler_params=pltpu.CompilerParams(
            dimension_semantics=("parallel", "parallel"),
            vmem_limit_bytes=32 * 1024 * 1024,
        ),
    )(x2, wqkv)
    qkv = qkv[:Mp].reshape(B, Tp, n_total)

    # ---- kernel 2: flash-style causal attention ------------------------------
    nq = Tp // tq
    nk = Tp // tk

    def _q_map(b, i, j):
        return (b, i, 0)

    def _kv_map(which):
        def _map(b, i, j):
            # Clamp at the causal diagonal: for fully-masked kv blocks the
            # block index repeats, so Pallas elides the K/V DMA entirely
            # (compute for those blocks is already skipped via pl.when).
            j_max = (i * tq + tq - 1) // tk
            return (b, jnp.minimum(j, j_max), which)
        return _map

    out = pl.pallas_call(
        _make_flash_causal_kernel(tq, tk),
        out_shape=jax.ShapeDtypeStruct((B, Tp, d_p), out_dtype),
        grid_spec=pltpu.PrefetchScalarGridSpec(
            num_scalar_prefetch=0,
            grid=(B, nq, nk),
            in_specs=[
                # q / k / v are slices of the same fused qkv array, selected by
                # the last-dim block index (0 / 1 / 2) -> no wrapper copies.
                pl.BlockSpec((pl.Squeezed(), tq, d_p), _q_map),
                pl.BlockSpec((pl.Squeezed(), tk, d_p), _kv_map(1)),
                pl.BlockSpec((pl.Squeezed(), tk, d_p), _kv_map(2)),
            ],
            out_specs=pl.BlockSpec(
                (pl.Squeezed(), tq, d_p), lambda b, i, j: (b, i, 0)
            ),
            scratch_shapes=[
                # Lane-dense running max / sum (avoid masked vst.msk stores),
                # plus the f32 accumulator.
                pltpu.VMEM((tq, d_p), jnp.float32),  # running max  m
                pltpu.VMEM((tq, d_p), jnp.float32),  # running sum  l
                pltpu.VMEM((tq, d_p), jnp.float32),  # f32 accumulator
            ],
        ),
        compiler_params=pltpu.CompilerParams(
            # Two parallel axes (B, q-tiles) so v7x's two TensorCores both get
            # work; kv is the reduction axis -> last and "arbitrary".
            dimension_semantics=("parallel", "parallel", "arbitrary"),
            # Tiles + scratch are ~1-2 MiB double-buffered: well within the
            # 32 MiB scoped budget even on v7x's halved (64 MiB) VMEM.
            vmem_limit_bytes=32 * 1024 * 1024,
        ),
    )(qkv, qkv, qkv)

    return out[:, :T, :d_out]


def reference_causal_attention(x, wq, wk, wv):
    """Pure-JAX f32 reference matching the PyTorch forward (eval-mode dropout)."""
    q = x @ wq
    k = x @ wk
    v = x @ wv
    scores = jnp.einsum("btd,bsd->bts", q, k)
    T = x.shape[1]
    mask = jnp.triu(jnp.ones((T, T), dtype=bool), k=1)
    scores = jnp.where(mask[None, :, :], -jnp.inf, scores)
    w = jax.nn.softmax(scores / math.sqrt(q.shape[-1]), axis=-1)
    return w @ v


if __name__ == "__main__":
    # Shapes implied by the module-level script: inputs is (6, 3),
    # batch = stack(inputs, inputs) -> (2, 6, 3); d_in=3, d_out=4.
    B, T, d_in, d_out = 2, 6, 3, 4

    inputs = jnp.array(
        [[0.43, 0.15, 0.89],
         [0.55, 0.87, 0.66],
         [0.57, 0.85, 0.64],
         [0.22, 0.58, 0.33],
         [0.77, 0.25, 0.10],
         [0.05, 0.80, 0.55]],
        dtype=jnp.float32,
    )
    x = jnp.stack([inputs, inputs], axis=0)  # (2, 6, 3)

    key = jax.random.PRNGKey(0)
    kq, kk, kv = jax.random.split(key, 3)

    # Deterministic init mimicking nn.Linear default: U(-1/sqrt(d_in), 1/sqrt(d_in)).
    bound = 1.0 / math.sqrt(d_in)
    w_query = jax.random.uniform(kq, (d_in, d_out), jnp.float32, -bound, bound)
    w_key = jax.random.uniform(kk, (d_in, d_out), jnp.float32, -bound, bound)
    w_value = jax.random.uniform(kv, (d_in, d_out), jnp.float32, -bound, bound)

    out = causal_attention(x, w_query, w_key, w_value)
    out = jax.block_until_ready(out)

    ref = reference_causal_attention(x, w_query, w_key, w_value)
    assert out.shape == (B, T, d_out)
    # Tolerance accounts for the bf16 Q/K/V intermediate (the f32 softmax /
    # accumulator path and exact-division finalize are unchanged).
    assert jnp.allclose(out, ref, atol=2e-2, rtol=2e-2), "mismatch vs reference"

    print("KERNEL_OK")
</pallas_src>

<mosaic_0001>
module attributes {stable_mosaic.version = 11 : i64} {
  func.func @_qkv_proj_kernel(%arg0: i32, %arg1: i32, %arg2: memref<512x128xf32, #tpu.memory_space<vmem>>, %arg3: memref<128x384xf32, #tpu.memory_space<vmem>>, %arg4: memref<512x384xbf16, #tpu.memory_space<vmem>>) attributes {dimension_semantics = [#tpu.dimension_semantics<parallel>, #tpu.dimension_semantics<parallel>], iteration_bounds = array<i64: 1, 1>, scalar_prefetch = 0 : i64, scratch_operands = 0 : i64, tpu.core_type = #tpu.core_type<tc>, window_params = [{transform_indices = @transform_0, window_bounds = array<i64: 512, 128>}, {transform_indices = @transform_1, window_bounds = array<i64: 128, 384>}, {transform_indices = @transform_2, window_bounds = array<i64: 512, 384>}]} {
    %c0 = arith.constant 0 : index
    %c0_0 = arith.constant 0 : index
    %0 = vector.load %arg2[%c0, %c0_0] : memref<512x128xf32, #tpu.memory_space<vmem>>, vector<512x128xf32>
    %c0_1 = arith.constant 0 : index
    %c0_2 = arith.constant 0 : index
    %1 = vector.load %arg3[%c0_1, %c0_2] : memref<128x384xf32, #tpu.memory_space<vmem>>, vector<128x384xf32>
    %cst = arith.constant dense<0.000000e+00> : vector<512x384xf32>
    %2 = tpu.matmul %0, %1, %cst {dimension_numbers = #tpu.dot_dimension_numbers<[1], [0], [0], [1], [0, 0, 1, 1], [], []>} : vector<512x128xf32>, vector<128x384xf32>, vector<512x384xf32> -> vector<512x384xf32>
    %3 = arith.truncf %2 : vector<512x384xf32> to vector<512x384xbf16>
    %c0_3 = arith.constant 0 : index
    %c0_4 = arith.constant 0 : index
    %4 = vector.load %arg4[%c0_3, %c0_4] : memref<512x384xbf16, #tpu.memory_space<vmem>>, vector<512x384xbf16>
    tpu.vector_store %arg4[%c0_3, %c0_4], %3 {strides = array<i32>} : memref<512x384xbf16, #tpu.memory_space<vmem>>, vector<512x384xbf16>,
    return
  }
  func.func @transform_0(%arg0: i32, %arg1: i32) -> (i32, i32) {
    %c0_i32 = arith.constant 0 : i32
    %c0_i32_0 = arith.constant 0 : i32
    return %arg0, %c0_i32 : i32, i32
  }
  func.func @transform_1(%arg0: i32, %arg1: i32) -> (i32, i32) {
    %c0_i32 = arith.constant 0 : i32
    %c0_i32_0 = arith.constant 0 : i32
    return %c0_i32, %arg1 : i32, i32
  }
  func.func @transform_2(%arg0: i32, %arg1: i32) -> (i32, i32) {
    %c0_i32 = arith.constant 0 : i32
    return %arg0, %arg1 : i32, i32
  }
}

</mosaic_0001>

<bundles_post_ra>
// kernel: tpu_custom_call.1
= control target key start
LH: loop header
LB: loop body
LE: loop exit
PB: predicated region body
PF: predicated region fallthrough
CT: control target
= control target key end

     0   :  { %7 = vsyncpa [#allocation3], 0  ;;  %s2627_s0 = inlined_call_operand.hbm [shape: f32[512,128], index: 0, kind: input, shape index: {}]   ;;  %s2628_s1 = inlined_call_operand.hbm [shape: f32[128,384], index: 1, kind: input, shape index: {}]   ;;  %s2629_s2 = inlined_call_operand.hbm [shape: bf16[512,384], index: 2, kind: output, shape index: {}]  }
   0x1   :  { %8 = vsyncpa [#allocation6], 0 }
   0x2   :  { %9 = vsyncpa [#allocation4], 0  ;;  %s2398_s9 = smov [#allocation2]   ;;  %s2326_s13 = scalar_lea.hbm %s2627_s0, 8192 }
   0x3   :  { %s15_s10 = sshll.u32 %s2398_s9, 4  ;;  %p2327_p0 = scmp.ne.s32.totalorder %s2627_s0, %s2326_s13  ;;  %s16_s10 = int_to_ptr.vmem [resolvable:$true] %s15_s10 }
   0x4   :  { %p2330_p1 = scmp.lt.u32.totalorder %s2326_s13, %s2627_s0 }
   0x6   :  { %p2332_p2 = pnand %p2330_p1, %p2327_p0 }
   0x8   :  { %2335 = shalt.err (!%p2332_p2)
}
   0x9   :  { %s2336_s18 = scalar_lea.vmem %s16_s10, 8192  ;;  %p2341_p4 = scmp.lt.s32.totalorder %s16_s10, %s16_s10 }
   0xa   :  { %p2337_p3 = scmp.ne.s32.totalorder %s16_s10, %s2336_s18  ;;  %p2342_p5 = scmp.lt.s32.totalorder %s2336_s18, %s2336_s18 }
   0xc   :  { %p2343_p6 = por %p2342_p5, %p2341_p4 }
   0xe   :  { %p2344_p7 = pnand %p2343_p6, %p2337_p3 }
  0x10   :  { %2347 = shalt.err (!%p2344_p7)
}
  0x11   :  { %s2399_s19 = smov 128   ;;  %s2400_s20 = smov 8  }
  0x12   :  { %21 = dma.hbm_to_vmem [thread:$0]  %s2627_s0, 8192, %s16_s10, [#allocation3], %s2399_s19, %s2399_s19, %s2400_s20  }
  0x13   :  { %s2401_s23 = smov [#allocation5]   ;;  %s2348_s27 = scalar_lea.hbm %s2628_s1, 6144 }
  0x14   :  { %s27_s24 = sshll.u32 %s2401_s23, 4  ;;  %p2349_p8 = scmp.ne.s32.totalorder %s2628_s1, %s2348_s27  ;;  %s28_s24 = int_to_ptr.vmem [resolvable:$true] %s27_s24 }
  0x15   :  { %p2352_p9 = scmp.lt.u32.totalorder %s2348_s27, %s2628_s1 }
  0x17   :  { %p2354_p10 = pnand %p2352_p9, %p2349_p8 }
  0x19   :  { %2357 = shalt.err (!%p2354_p10)
}
  0x1a   :  { %s2358_s4 = scalar_lea.vmem %s28_s24, 6144  ;;  %p2363_p12 = scmp.lt.s32.totalorder %s28_s24, %s28_s24 }
  0x1b   :  { %p2359_p11 = scmp.ne.s32.totalorder %s28_s24, %s2358_s4  ;;  %p2364_p13 = scmp.lt.s32.totalorder %s2358_s4, %s2358_s4 }
  0x1d   :  { %p2365_p0 = por %p2364_p13, %p2363_p12 }
  0x1f   :  { %p2366_p1 = pnand %p2365_p0, %p2359_p11 }
  0x21   :  { %2369 = shalt.err (!%p2366_p1)
}
  0x22   :  { %s2402_s0 = smov 384   ;;  %s2403_s5 = smov 24  }
  0x23   :  { %33 = dma.hbm_to_vmem [thread:$0]  %s2628_s1, 6144, %s28_s24, [#allocation6], %s2402_s0, %s2402_s0, %s2403_s5  }
  0x24   :  { %2392 = dma.done.wait [#allocation3], 8192  }
  0x25   :  { %2393 = vsyncadd [#allocation3], 4294959104 }
  0x26   :  { %2394 = dma.done.wait [#allocation6], 6144  }
  0x27   :  { %2395 = vsyncadd [#allocation6], 4294961152  ;;  %v2404_v0 = vmov 0.0   ;;  %v105_v1 = vld [vmem:[#allocation5 + $0x8] sm:$0xff]  ;;  %v108_v2 = vld [vmem:[#allocation5 + $0x20] sm:$0xff]  ;;  %s2405_s1 = smov [#allocation7]  }
  0x28   :  { %216 = vmatprep.mubr.f32.mxu0 %v2404_v0  ;;  %504 = vmatprep.mubr.f32.mxu1 %v2404_v0  ;;  %v104_v3 = vld [vmem:[#allocation5] sm:$0xff]  ;;  %v2236_v4 = vpack.c.bf16 %v108_v2, %v105_v1  ;;  %v107_v5 = vld [vmem:[#allocation5 + $0x18] sm:$0xff]  ;;  %v114_v7 = vld [vmem:[#allocation5 + $0x50] sm:$0xff]  ;;  %s1759_s8 = sshll.u32 %s2405_s1, 4  ;;  %s1760_s8 = int_to_ptr.vmem [resolvable:$true] %s1759_s8 }
  0x29   :  { %v111_v6 = vld [vmem:[#allocation5 + $0x38] sm:$0xff]  ;;  %v2238_v8 = vpack.c.bf16 %v107_v5, %v104_v3  ;;  %v110_v10 = vld [vmem:[#allocation5 + $0x30] sm:$0xff]  ;;  %v113_v11 = vld [vmem:[#allocation5 + $0x48] sm:$0xff]  ;;  %s2370_s9 = scalar_lea.vmem %s1760_s8, 12288  ;;  %p2375_p3 = scmp.lt.s32.totalorder %s1760_s8, %s1760_s8 }
  0x2a   :  { %v2240_v9 = vpack.c.bf16 %v114_v7, %v111_v6  ;;  %v117_v12 = vld [vmem:[#allocation5 + $0x68] sm:$0xff]  ;;  %2237 = vmatprep.subr.bf16.mxu0 %v2236_v4  ;;  %2300 = vmatprep.subr.bf16.mxu1 %v2236_v4  ;;  %v120_v13 = vld [vmem:[#allocation5 + $0x80] sm:$0xff]  ;;  %v2242_v14 = vpack.c.bf16 %v113_v11, %v110_v10  ;;  %v119_v17 = vld [vmem:[#allocation5 + $0x78] sm:$0xff]  ;;  %p2371_p2 = scmp.ne.s32.totalorder %s1760_s8, %s2370_s9  ;;  %p2376_p4 = scmp.lt.s32.totalorder %s2370_s9, %s2370_s9 }
  0x2b   :  { %2239 = vmatpush1.bf16.msra.mxu0 %v2238_v8  ;;  %2308 = vmatpush1.bf16.msra.mxu1 %v2238_v8  ;;  %v2244_v15 = vpack.c.bf16 %v120_v13, %v117_v12  ;;  %v116_v16 = vld [vmem:[#allocation5 + $0x60] sm:$0xff]  ;;  %v123_v18 = vld [vmem:[#allocation5 + $0x98] sm:$0xff]  ;;  %v126_v19 = vld [vmem:[#allocation5 + $0xb0] sm:$0xff] }
  0x2c   :  { %2241 = vmatprep.subr.bf16.mxu0 %v2240_v9  ;;  %2301 = vmatprep.subr.bf16.mxu1 %v2240_v9  ;;  %v2246_v20 = vpack.c.bf16 %v119_v17, %v116_v16  ;;  %v2248_v21 = vpack.c.bf16 %v126_v19, %v123_v18  ;;  %v122_v22 = vld [vmem:[#allocation5 + $0x90] sm:$0xff]  ;;  %v125_v23 = vld [vmem:[#allocation5 + $0xa8] sm:$0xff]  ;;  %v132_v25 = vld [vmem:[#allocation5 + $0xe0] sm:$0xff]  ;;  %p2377_p5 = por %p2376_p4, %p2375_p3 }
  0x2d   :  { %v129_v24 = vld [vmem:[#allocation5 + $0xc8] sm:$0xff]  ;;  %v2250_v26 = vpack.c.bf16 %v125_v23, %v122_v22  ;;  %v128_v28 = vld [vmem:[#allocation5 + $0xc0] sm:$0xff]  ;;  %v131_v29 = vld [vmem:[#allocation5 + $0xd8] sm:$0xff] }
  0x2e   :  { %v2252_v27 = vpack.c.bf16 %v132_v25, %v129_v24  ;;  %v135_v30 = vld [vmem:[#allocation5 + $0xf8] sm:$0xff]  ;;  %v138_v31 = vld [vmem:[#allocation5 + $0x110] sm:$0xff]  ;;  %v2254_v32 = vpack.c.bf16 %v131_v29, %v128_v28  ;;  %v137_v35 = vld [vmem:[#allocation5 + $0x108] sm:$0xff]  ;;  %p2378_p6 = pnand %p2377_p5, %p2371_p2 }
  0x2f   :  { %2243 = vmatpush1.bf16.msra.mxu0 %v2242_v14  ;;  %2309 = vmatpush1.bf16.msra.mxu1 %v2242_v14  ;;  %v2256_v33 = vpack.c.bf16 %v138_v31, %v135_v30  ;;  %v134_v34 = vld [vmem:[#allocation5 + $0xf0] sm:$0xff]  ;;  %v141_v36 = vld [vmem:[#allocation5 + $0x128] sm:$0xff]  ;;  %v144_v37 = vld [vmem:[#allocation5 + $0x140] sm:$0xff] }
  0x30   :  { %2245 = vmatprep.subr.bf16.mxu0 %v2244_v15  ;;  %2302 = vmatprep.subr.bf16.mxu1 %v2244_v15  ;;  %v2258_v38 = vpack.c.bf16 %v137_v35, %v134_v34  ;;  %v2260_v39 = vpack.c.bf16 %v144_v37, %v141_v36  ;;  %v140_v40 = vld [vmem:[#allocation5 + $0x120] sm:$0xff]  ;;  %v143_v41 = vld [vmem:[#allocation5 + $0x138] sm:$0xff]  ;;  %v150_v43 = vld [vmem:[#allocation5 + $0x170] sm:$0xff] }
  0x31   :  { %v147_v42 = vld [vmem:[#allocation5 + $0x158] sm:$0xff]  ;;  %v2262_v44 = vpack.c.bf16 %v143_v41, %v140_v40  ;;  %v146_v46 = vld [vmem:[#allocation5 + $0x150] sm:$0xff]  ;;  %v149_v47 = vld [vmem:[#allocation5 + $0x168] sm:$0xff] }
  0x32   :  { %v2264_v45 = vpack.c.bf16 %v150_v43, %v147_v42  ;;  %v106_v48 = vld [vmem:[#allocation5 + $0x10] sm:$0xff]  ;;  %v109_v49 = vld [vmem:[#allocation5 + $0x28] sm:$0xff]  ;;  %v2266_v50 = vpack.c.bf16 %v149_v47, %v146_v46  ;;  %v112_v52 = vld [vmem:[#allocation5 + $0x40] sm:$0xff] }
  0x33   :  { %2247 = vmatpush1.bf16.msra.mxu0 %v2246_v20  ;;  %2310 = vmatpush1.bf16.msra.mxu1 %v2246_v20  ;;  %v2268_v51 = vpack.c.bf16 %v109_v49, %v106_v48  ;;  %v115_v53 = vld [vmem:[#allocation5 + $0x58] sm:$0xff]  ;;  %v2449_v54 = vld [vmem:[#allocation2] sm:$0xff]  ;;  %v118_v57 = vld [vmem:[#allocation5 + $0x70] sm:$0xff] }
  0x34   :  { %2249 = vmatprep.subr.bf16.mxu0 %v2248_v21  ;;  %2303 = vmatprep.subr.bf16.mxu1 %v2248_v21  ;;  %v2451_v55 = vld [vmem:[#allocation2 + $0x180] sm:$0xff]  ;;  %v2272_v56 = vpack.c.bf16 %v115_v53, %v112_v52  ;;  %v121_v58 = vld [vmem:[#allocation5 + $0x88] sm:$0xff]  ;;  %v127_v63 = vld [vmem:[#allocation5 + $0xb8] sm:$0xff] }
  0x35   :  { %v2456_v59 = vld [vmem:[#allocation2 + $0x8] sm:$0xff]  ;;  %v2276_v61 = vpack.c.bf16 %v121_v58, %v118_v57  ;;  %v124_v62 = vld [vmem:[#allocation5 + $0xa0] sm:$0xff]  ;;  %v2465_v1 = vld [vmem:[#allocation2 + $0x10] sm:$0xff] }
  0x36   :  { %v2458_v60 = vld [vmem:[#allocation2 + $0x188] sm:$0xff]  ;;  %v2467_v2 = vld [vmem:[#allocation2 + $0x190] sm:$0xff]  ;;  %v2280_v3 = vpack.c.bf16 %v127_v63, %v124_v62  ;;  %v2473_v6 = vld [vmem:[#allocation2 + $0x18] sm:$0xff] }
  0x37   :  { %2251 = vmatpush1.bf16.msra.mxu0 %v2250_v26  ;;  %2311 = vmatpush1.bf16.msra.mxu1 %v2250_v26  ;;  %v130_v4 = vld [vmem:[#allocation5 + $0xd0] sm:$0xff]  ;;  %v133_v5 = vld [vmem:[#allocation5 + $0xe8] sm:$0xff]  ;;  %v2475_v7 = vld [vmem:[#allocation2 + $0x198] sm:$0xff] }
  0x38   :  { %2253 = vmatprep.subr.bf16.mxu0 %v2252_v27  ;;  %2304 = vmatprep.subr.bf16.mxu1 %v2252_v27  ;;  %v2284_v8 = vpack.c.bf16 %v133_v5, %v130_v4  ;;  %v136_v9 = vld [vmem:[#allocation5 + $0x100] sm:$0xff]  ;;  %v139_v10 = vld [vmem:[#allocation5 + $0x118] sm:$0xff]  ;;  %v142_v14 = vld [vmem:[#allocation5 + $0x130] sm:$0xff] }
  0x39   :  { %v2481_v11 = vld [vmem:[#allocation2 + $0x20] sm:$0xff]  ;;  %v2288_v13 = vpack.c.bf16 %v139_v10, %v136_v9  ;;  %v145_v15 = vld [vmem:[#allocation5 + $0x148] sm:$0xff]  ;;  %v151_v20 = vld [vmem:[#allocation5 + $0x178] sm:$0xff] }
  0x3a   :  { %v2483_v12 = vld [vmem:[#allocation2 + $0x1a0] sm:$0xff]  ;;  %v2489_v16 = vld [vmem:[#allocation2 + $0x28] sm:$0xff]  ;;  %v2292_v18 = vpack.c.bf16 %v145_v15, %v142_v14  ;;  %v2497_v21 = vld [vmem:[#allocation2 + $0x30] sm:$0xff] }
  0x3b   :  { %2255 = vmatpush1.bf16.msra.mxu0 %v2254_v32  ;;  %2312 = vmatpush1.bf16.msra.mxu1 %v2254_v32  ;;  %v2491_v17 = vld [vmem:[#allocation2 + $0x1a8] sm:$0xff]  ;;  %v148_v19 = vld [vmem:[#allocation5 + $0x160] sm:$0xff]  ;;  %v2499_v22 = vld [vmem:[#allocation2 + $0x1b0] sm:$0xff] }
  0x3c   :  { %2257 = vmatprep.subr.bf16.mxu0 %v2256_v33  ;;  %2305 = vmatprep.subr.bf16.mxu1 %v2256_v33  ;;  %v2296_v23 = vpack.c.bf16 %v151_v20, %v148_v19  ;;  %v2505_v24 = vld [vmem:[#allocation2 + $0x38] sm:$0xff]  ;;  %v2513_v26 = vld [vmem:[#allocation2 + $0x40] sm:$0xff]  ;;  %v2521_v28 = vld [vmem:[#allocation2 + $0x48] sm:$0xff] }
  0x3d   :  { %v2507_v25 = vld [vmem:[#allocation2 + $0x1b8] sm:$0xff]  ;;  %v2515_v27 = vld [vmem:[#allocation2 + $0x1c0] sm:$0xff]  ;;  %v2523_v29 = vld [vmem:[#allocation2 + $0x1c8] sm:$0xff] }
  0x3e   :  { %v50_v30 = vld [vmem:[#allocation2 + $0x50] sm:$0xff]  ;;  %v51_v32 = vld [vmem:[#allocation2 + $0x58] sm:$0xff]  ;;  %v52_v34 = vld [vmem:[#allocation2 + $0x60] sm:$0xff] }
  0x3f   :  { %2259 = vmatpush1.bf16.msra.mxu0 %v2258_v38  ;;  %2313 = vmatpush1.bf16.msra.mxu1 %v2258_v38  ;;  %v2529_v31 = vld [vmem:[#allocation2 + $0x1d0] sm:$0xff]  ;;  %v2534_v33 = vld [vmem:[#allocation2 + $0x1d8] sm:$0xff]  ;;  %v2539_v35 = vld [vmem:[#allocation2 + $0x1e0] sm:$0xff] }
  0x40   :  { %2261 = vmatprep.subr.bf16.mxu0 %v2260_v39  ;;  %2306 = vmatprep.subr.bf16.mxu1 %v2260_v39  ;;  %v53_v36 = vld [vmem:[#allocation2 + $0x68] sm:$0xff]  ;;  %v54_v38 = vld [vmem:[#allocation2 + $0x70] sm:$0xff]  ;;  %v55_v40 = vld [vmem:[#allocation2 + $0x78] sm:$0xff] }
  0x41   :  { %v2544_v37 = vld [vmem:[#allocation2 + $0x1e8] sm:$0xff]  ;;  %v2549_v39 = vld [vmem:[#allocation2 + $0x1f0] sm:$0xff]  ;;  %v2554_v41 = vld [vmem:[#allocation2 + $0x1f8] sm:$0xff] }
  0x42   :  { %v56_v42 = vld [vmem:[#allocation2 + $0x80] sm:$0xff]  ;;  %v57_v43 = vld [vmem:[#allocation2 + $0x88] sm:$0xff]  ;;  %v62_v48 = vld [vmem:[#allocation2 + $0xb0] sm:$0xff] }
  0x43   :  { %2263 = vmatpush1.bf16.msra.mxu0 %v2262_v44  ;;  %2314 = vmatpush1.bf16.msra.mxu1 %v2262_v44  ;;  %v58_v44 = vld [vmem:[#allocation2 + $0x90] sm:$0xff]  ;;  %v60_v46 = vld [vmem:[#allocation2 + $0xa0] sm:$0xff]  ;;  %v61_v47 = vld [vmem:[#allocation2 + $0xa8] sm:$0xff] }
  0x44   :  { %2265 = vmatprep.subr.bf16.mxu0 %v2264_v45  ;;  %2307 = vmatprep.subr.bf16.mxu1 %v2264_v45  ;;  %v59_v45 = vld [vmem:[#allocation2 + $0x98] sm:$0xff]  ;;  %v66_v52 = vld [vmem:[#allocation2 + $0xd0] sm:$0xff] }
  0x45   :  { %v63_v49 = vld [vmem:[#allocation2 + $0xb8] sm:$0xff]  ;;  %v70_v57 = vld [vmem:[#allocation2 + $0xf0] sm:$0xff] }
  0x46   :  { %v67_v53 = vld [vmem:[#allocation2 + $0xd8] sm:$0xff]  ;;  %v74_v62 = vld [vmem:[#allocation2 + $0x110] sm:$0xff] }
  0x47   :  { %2267 = vmatpush1.bf16.msra.mxu0 %v2266_v50  ;;  %2315 = vmatpush1.bf16.msra.mxu1 %v2266_v50  ;;  %v64_v50 = vld [vmem:[#allocation2 + $0xc0] sm:$0xff]  ;;  %v71_v58 = vld [vmem:[#allocation2 + $0xf8] sm:$0xff]  ;;  %v78_v4 = vld [vmem:[#allocation2 + $0x130] sm:$0xff] }
  0x48   :  { %2269 = vmatprep.subr.bf16.mxu1 %v2268_v51  ;;  %v75_v63 = vld [vmem:[#allocation2 + $0x118] sm:$0xff]  ;;  %v82_v9 = vld [vmem:[#allocation2 + $0x150] sm:$0xff] }
  0x49   :  { %v79_v5 = vld [vmem:[#allocation2 + $0x138] sm:$0xff]  ;;  %v86_v14 = vld [vmem:[#allocation2 + $0x170] sm:$0xff] }
  0x4a   :  { %217 = vmatmul.mubr.f32.vlgmr.msra.gmra.mrb[0].mxu0 %v2449_v54  ;;  %505 = vmatmul.mubr.f32.vlgmr.msra.gmra.mrb[0].mxu1 %v2451_v55  ;;  %v83_v10 = vld [vmem:[#allocation2 + $0x158] sm:$0xff] }
  0x4b   :  { %2271 = vmatpush3.bf16.msra.mxu1 %v2268_v51  ;;  %222 = vmatprep.mubr.f32.mxu0 %v2404_v0  ;;  %v65_v51 = vld [vmem:[#allocation2 + $0xc8] sm:$0xff]  ;;  %v87_v15 = vld [vmem:[#allocation2 + $0x178] sm:$0xff] }
  0x4c   :  { %510 = vmatprep.mubr.f32.mxu1 %v2404_v0  ;;  %2273 = vmatprep.subr.bf16.mxu1 %v2272_v56 }
  0x4e   :  { %223 = vmatmul.mubr.f32.gmra.mrb[2].mxu0 %v2456_v59  ;;  %511 = vmatmul.mubr.f32.gmra.mrb[2].mxu1 %v2458_v60 }
  0x4f   :  { %228 = vmatprep.mubr.f32.mxu0 %v2404_v0  ;;  %516 = vmatprep.mubr.f32.mxu1 %v2404_v0 }
  0x50   :  { %2275 = vmatpush3.bf16.msra.mxu1 %v2272_v56  ;;  %v69_v56 = vld [vmem:[#allocation2 + $0xe8] sm:$0xff] }
  0x51   :  { %2277 = vmatprep.subr.bf16.mxu1 %v2276_v61 }
  0x52   :  { %229 = vmatmul.mubr.f32.gmra.mrb[4].mxu0 %v2465_v1  ;;  %517 = vmatmul.mubr.f32.gmra.mrb[4].mxu1 %v2467_v2 }
  0x53   :  { %234 = vmatprep.mubr.f32.mxu0 %v2404_v0  ;;  %522 = vmatprep.mubr.f32.mxu1 %v2404_v0 }
  0x54   :  { %2279 = vmatpush3.bf16.msra.mxu1 %v2276_v61  ;;  %v73_v61 = vld [vmem:[#allocation2 + $0x108] sm:$0xff] }
  0x55   :  { %2281 = vmatprep.subr.bf16.mxu1 %v2280_v3 }
  0x56   :  { %235 = vmatmul.mubr.f32.gmra.mrb[6].mxu0 %v2473_v6  ;;  %523 = vmatmul.mubr.f32.gmra.mrb[6].mxu1 %v2475_v7 }
  0x57   :  { %240 = vmatprep.mubr.f32.mxu0 %v2404_v0  ;;  %528 = vmatprep.mubr.f32.mxu1 %v2404_v0 }
  0x58   :  { %2283 = vmatpush3.bf16.msra.mxu1 %v2280_v3  ;;  %v77_v3 = vld [vmem:[#allocation2 + $0x128] sm:$0xff] }
  0x59   :  { %2285 = vmatprep.subr.bf16.mxu1 %v2284_v8 }
  0x5a   :  { %241 = vmatmul.mubr.f32.gmra.mrb[8].mxu0 %v2481_v11  ;;  %529 = vmatmul.mubr.f32.gmra.mrb[8].mxu1 %v2483_v12 }
  0x5b   :  { %246 = vmatprep.mubr.f32.mxu0 %v2404_v0  ;;  %534 = vmatprep.mubr.f32.mxu1 %v2404_v0 }
  0x5c   :  { %2287 = vmatpush3.bf16.msra.mxu1 %v2284_v8  ;;  %v81_v8 = vld [vmem:[#allocation2 + $0x148] sm:$0xff] }
  0x5d   :  { %2289 = vmatprep.subr.bf16.mxu1 %v2288_v13 }
  0x5e   :  { %247 = vmatmul.mubr.f32.gmra.mrb[10].mxu0 %v2489_v16  ;;  %535 = vmatmul.mubr.f32.gmra.mrb[10].mxu1 %v2491_v17 }
  0x5f   :  { %252 = vmatprep.mubr.f32.mxu0 %v2404_v0  ;;  %540 = vmatprep.mubr.f32.mxu1 %v2404_v0 }
  0x60   :  { %2291 = vmatpush3.bf16.msra.mxu1 %v2288_v13  ;;  %v85_v13 = vld [vmem:[#allocation2 + $0x168] sm:$0xff] }
  0x61   :  { %2293 = vmatprep.subr.bf16.mxu1 %v2292_v18 }
  0x62   :  { %253 = vmatmul.mubr.f32.gmra.mrb[12].mxu0 %v2497_v21  ;;  %541 = vmatmul.mubr.f32.gmra.mrb[12].mxu1 %v2499_v22 }
  0x63   :  { %258 = vmatprep.mubr.f32.mxu0 %v2404_v0  ;;  %546 = vmatprep.mubr.f32.mxu1 %v2404_v0 }
  0x64   :  { %2295 = vmatpush3.bf16.msra.mxu1 %v2292_v18 }
  0x65   :  { %2297 = vmatprep.subr.bf16.mxu1 %v2296_v23 }
  0x66   :  { %259 = vmatmul.mubr.f32.gmra.mrb[14].mxu0 %v2505_v24  ;;  %547 = vmatmul.mubr.f32.gmra.mrb[14].mxu1 %v2507_v25 }
  0x67   :  { %264 = vmatprep.mubr.f32.mxu0 %v2404_v0  ;;  %552 = vmatprep.mubr.f32.mxu1 %v2404_v0 }
  0x68   :  { %2299 = vmatpush3.bf16.msra.mxu1 %v2296_v23 }
  0x6a   :  { %265 = vmatmul.mubr.f32.gmra.mrb[16].mxu0 %v2513_v26  ;;  %553 = vmatmul.mubr.f32.gmra.mrb[16].mxu1 %v2515_v27 }
  0x6b   :  { %270 = vmatprep.mubr.f32.mxu0 %v2404_v0  ;;  %558 = vmatprep.mubr.f32.mxu1 %v2404_v0 }
  0x6e   :  { %271 = vmatmul.mubr.f32.gmra.mrb[18].mxu0 %v2521_v28  ;;  %559 = vmatmul.mubr.f32.gmra.mrb[18].mxu1 %v2523_v29 }
  0x6f   :  { %276 = vmatprep.mubr.f32.mxu0 %v2404_v0  ;;  %564 = vmatprep.mubr.f32.mxu1 %v2404_v0 }
  0x72   :  { %277 = vmatmul.mubr.f32.gmra.mrb[20].mxu0 %v50_v30  ;;  %565 = vmatmul.mubr.f32.gmra.mrb[20].mxu1 %v2529_v31 }
  0x73   :  { %282 = vmatprep.mubr.f32.mxu0 %v2404_v0  ;;  %570 = vmatprep.mubr.f32.mxu1 %v2404_v0 }
  0x76   :  { %283 = vmatmul.mubr.f32.gmra.mrb[22].mxu0 %v51_v32  ;;  %571 = vmatmul.mubr.f32.gmra.mrb[22].mxu1 %v2534_v33 }
  0x77   :  { %288 = vmatprep.mubr.f32.mxu0 %v2404_v0  ;;  %576 = vmatprep.mubr.f32.mxu1 %v2404_v0 }
  0x7a   :  { %289 = vmatmul.mubr.f32.gmra.mrb[24].mxu0 %v52_v34  ;;  %577 = vmatmul.mubr.f32.gmra.mrb[24].mxu1 %v2539_v35 }
  0x7b   :  { %294 = vmatprep.mubr.f32.mxu0 %v2404_v0  ;;  %582 = vmatprep.mubr.f32.mxu1 %v2404_v0 }
  0x7e   :  { %295 = vmatmul.mubr.f32.gmra.mrb[26].mxu0 %v53_v36  ;;  %583 = vmatmul.mubr.f32.gmra.mrb[26].mxu1 %v2544_v37 }
  0x7f   :  { %300 = vmatprep.mubr.f32.mxu0 %v2404_v0  ;;  %588 = vmatprep.mubr.f32.mxu1 %v2404_v0 }
  0x82   :  { %301 = vmatmul.mubr.f32.gmra.mrb[28].mxu0 %v54_v38  ;;  %589 = vmatmul.mubr.f32.gmra.mrb[28].mxu1 %v2549_v39 }
  0x83   :  { %306 = vmatprep.mubr.f32.mxu0 %v2404_v0  ;;  %594 = vmatprep.mubr.f32.mxu1 %v2404_v0 }
  0x86   :  { %307 = vmatmul.mubr.f32.gmra.mrb[30].mxu0 %v55_v40  ;;  %595 = vmatmul.mubr.f32.gmra.mrb[30].mxu1 %v2554_v41 }
  0x87   :  { %312 = vmatprep.mubr.f32.mxu0 %v2404_v0  ;;  %2140 = vmatprep.mubr.f32.mxu1 %v2449_v54  ;;  %v68_v54 = vld [vmem:[#allocation2 + $0xe0] sm:$0xff] }
  0x8a   :  { %313 = vmatmul.mubr.f32.gmra.mrb[32].mxu0 %v56_v42  ;;  %2141 = vmatmul.mubr.f32.vlgmr.msra.gmra.mrb[32].mxu1 %v2456_v59  ;;  %v72_v59 = vld [vmem:[#allocation2 + $0x100] sm:$0xff] }
  0x8b   :  { %318 = vmatprep.mubr.f32.mxu0 %v2404_v0  ;;  %2143 = vmatprep.mubr.f32.mxu1 %v2465_v1  ;;  %v76_v1 = vld [vmem:[#allocation2 + $0x120] sm:$0xff] }
  0x8e   :  { %319 = vmatmul.mubr.f32.gmra.mrb[34].mxu0 %v57_v43  ;;  %2144 = vmatmul.mubr.f32.gmra.mrb[34].mxu1 %v2473_v6  ;;  %v80_v6 = vld [vmem:[#allocation2 + $0x140] sm:$0xff] }
  0x8f   :  { %324 = vmatprep.mubr.f32.mxu0 %v2404_v0  ;;  %2146 = vmatprep.mubr.f32.mxu1 %v2481_v11  ;;  %v84_v11 = vld [vmem:[#allocation2 + $0x160] sm:$0xff] }
  0x92   :  { %325 = vmatmul.mubr.f32.gmra.mrb[36].mxu0 %v58_v44  ;;  %2147 = vmatmul.mubr.f32.gmra.mrb[36].mxu1 %v2489_v16 }
  0x93   :  { %330 = vmatprep.mubr.f32.mxu0 %v2404_v0  ;;  %2149 = vmatprep.mubr.f32.mxu1 %v2497_v21 }
  0x96   :  { %331 = vmatmul.mubr.f32.gmra.mrb[38].mxu0 %v59_v45  ;;  %2150 = vmatmul.mubr.f32.gmra.mrb[38].mxu1 %v2505_v24 }
  0x97   :  { %336 = vmatprep.mubr.f32.mxu0 %v2404_v0  ;;  %2152 = vmatprep.mubr.f32.mxu1 %v2513_v26 }
  0x9a   :  { %337 = vmatmul.mubr.f32.gmra.mrb[40].mxu0 %v60_v46  ;;  %2153 = vmatmul.mubr.f32.gmra.mrb[40].mxu1 %v2521_v28 }
  0x9b   :  { %342 = vmatprep.mubr.f32.mxu0 %v2404_v0  ;;  %2155 = vmatprep.mubr.f32.mxu1 %v50_v30 }
  0x9e   :  { %343 = vmatmul.mubr.f32.gmra.mrb[42].mxu0 %v61_v47  ;;  %2156 = vmatmul.mubr.f32.gmra.mrb[42].mxu1 %v51_v32 }
  0x9f   :  { %348 = vmatprep.mubr.f32.mxu0 %v2404_v0  ;;  %2158 = vmatprep.mubr.f32.mxu1 %v52_v34 }
  0xa2   :  { %349 = vmatmul.mubr.f32.gmra.mrb[44].mxu0 %v62_v48  ;;  %2159 = vmatmul.mubr.f32.gmra.mrb[44].mxu1 %v53_v36 }
  0xa3   :  { %354 = vmatprep.mubr.f32.mxu0 %v2404_v0  ;;  %2161 = vmatprep.mubr.f32.mxu1 %v54_v38 }
  0xa6   :  { %355 = vmatmul.mubr.f32.gmra.mrb[46].mxu0 %v63_v49  ;;  %2162 = vmatmul.mubr.f32.gmra.mrb[46].mxu1 %v55_v40 }
  0xa7   :  { %360 = vmatprep.mubr.f32.mxu0 %v2404_v0  ;;  %2164 = vmatprep.mubr.f32.mxu1 %v56_v42 }
  0xaa   :  { %361 = vmatmul.mubr.f32.gmra.mrb[48].mxu0 %v64_v50  ;;  %2165 = vmatmul.mubr.f32.gmra.mrb[48].mxu1 %v57_v43 }
  0xab   :  { %366 = vmatprep.mubr.f32.mxu0 %v2404_v0  ;;  %2167 = vmatprep.mubr.f32.mxu1 %v58_v44 }
  0xae   :  { %367 = vmatmul.mubr.f32.gmra.mrb[50].mxu0 %v65_v51  ;;  %2168 = vmatmul.mubr.f32.gmra.mrb[50].mxu1 %v59_v45 }
  0xaf   :  { %372 = vmatprep.mubr.f32.mxu0 %v2404_v0  ;;  %2170 = vmatprep.mubr.f32.mxu1 %v60_v46 }
  0xb2   :  { %373 = vmatmul.mubr.f32.gmra.mrb[52].mxu0 %v66_v52  ;;  %2171 = vmatmul.mubr.f32.gmra.mrb[52].mxu1 %v61_v47 }
  0xb3   :  { %378 = vmatprep.mubr.f32.mxu0 %v2404_v0  ;;  %2173 = vmatprep.mubr.f32.mxu1 %v62_v48 }
  0xb6   :  { %379 = vmatmul.mubr.f32.gmra.mrb[54].mxu0 %v67_v53  ;;  %2174 = vmatmul.mubr.f32.gmra.mrb[54].mxu1 %v63_v49 }
  0xb7   :  { %384 = vmatprep.mubr.f32.mxu0 %v2404_v0  ;;  %2176 = vmatprep.mubr.f32.mxu1 %v64_v50 }
  0xba   :  { %385 = vmatmul.mubr.f32.gmra.mrb[56].mxu0 %v68_v54  ;;  %2177 = vmatmul.mubr.f32.gmra.mrb[56].mxu1 %v65_v51 }
  0xbb   :  { %390 = vmatprep.mubr.f32.mxu0 %v2404_v0  ;;  %2179 = vmatprep.mubr.f32.mxu1 %v66_v52 }
  0xbe   :  { %391 = vmatmul.mubr.f32.gmra.mrb[58].mxu0 %v69_v56  ;;  %2180 = vmatmul.mubr.f32.gmra.mrb[58].mxu1 %v67_v53 }
  0xbf   :  { %396 = vmatprep.mubr.f32.mxu0 %v2404_v0  ;;  %2182 = vmatprep.mubr.f32.mxu1 %v68_v54 }
  0xc2   :  { %397 = vmatmul.mubr.f32.gmra.mrb[60].mxu0 %v70_v57  ;;  %2183 = vmatmul.mubr.f32.gmra.mrb[60].mxu1 %v69_v56 }
  0xc3   :  { %402 = vmatprep.mubr.f32.mxu0 %v2404_v0  ;;  %2185 = vmatprep.mubr.f32.mxu1 %v70_v57 }
  0xc6   :  { %403 = vmatmul.mubr.f32.gmra.mrb[62].mxu0 %v71_v58  ;;  %2186 = vmatmul.mubr.f32.gmra.mrb[62].mxu1 %v71_v58 }
  0xc7   :  { %408 = vmatprep.mubr.f32.mxu0 %v2404_v0  ;;  %2188 = vmatprep.mubr.f32.mxu1 %v72_v59 }
  0xca   :  { %409 = vmatmul.mubr.f32.gmra.mrb[64].mxu0 %v72_v59  ;;  %2189 = vmatmul.mubr.f32.gmra.mrb[64].mxu1 %v73_v61 }
  0xcb   :  { %414 = vmatprep.mubr.f32.mxu0 %v2404_v0  ;;  %2191 = vmatprep.mubr.f32.mxu1 %v74_v62 }
  0xce   :  { %415 = vmatmul.mubr.f32.gmra.mrb[66].mxu0 %v73_v61  ;;  %2192 = vmatmul.mubr.f32.gmra.mrb[66].mxu1 %v75_v63 }
  0xcf   :  { %420 = vmatprep.mubr.f32.mxu0 %v2404_v0  ;;  %2194 = vmatprep.mubr.f32.mxu1 %v76_v1 }
  0xd2   :  { %421 = vmatmul.mubr.f32.gmra.mrb[68].mxu0 %v74_v62  ;;  %2195 = vmatmul.mubr.f32.gmra.mrb[68].mxu1 %v77_v3 }
  0xd3   :  { %426 = vmatprep.mubr.f32.mxu0 %v2404_v0  ;;  %2197 = vmatprep.mubr.f32.mxu1 %v78_v4 }
  0xd6   :  { %427 = vmatmul.mubr.f32.gmra.mrb[70].mxu0 %v75_v63  ;;  %2198 = vmatmul.mubr.f32.gmra.mrb[70].mxu1 %v79_v5 }
  0xd7   :  { %432 = vmatprep.mubr.f32.mxu0 %v2404_v0  ;;  %2200 = vmatprep.mubr.f32.mxu1 %v80_v6 }
  0xda   :  { %433 = vmatmul.mubr.f32.gmra.mrb[72].mxu0 %v76_v1  ;;  %2201 = vmatmul.mubr.f32.gmra.mrb[72].mxu1 %v81_v8 }
  0xdb   :  { %438 = vmatprep.mubr.f32.mxu0 %v2404_v0  ;;  %2203 = vmatprep.mubr.f32.mxu1 %v82_v9 }
  0xde   :  { %439 = vmatmul.mubr.f32.gmra.mrb[74].mxu0 %v77_v3  ;;  %2204 = vmatmul.mubr.f32.gmra.mrb[74].mxu1 %v83_v10 }
  0xdf   :  { %444 = vmatprep.mubr.f32.mxu0 %v2404_v0  ;;  %2206 = vmatprep.mubr.f32.mxu1 %v84_v11 }
  0xe2   :  { %445 = vmatmul.mubr.f32.gmra.mrb[76].mxu0 %v78_v4  ;;  %2207 = vmatmul.mubr.f32.gmra.mrb[76].mxu1 %v85_v13 }
  0xe3   :  { %450 = vmatprep.mubr.f32.mxu0 %v2404_v0  ;;  %2209 = vmatprep.mubr.f32.mxu1 %v86_v14 }
  0xe6   :  { %451 = vmatmul.mubr.f32.gmra.mrb[78].mxu0 %v79_v5  ;;  %2210 = vmatmul.mubr.f32.gmra.mrb[78].mxu1 %v87_v15 }
  0xe7   :  { %456 = vmatprep.mubr.f32.mxu0 %v2404_v0  ;;  %2212 = vmatprep.mubr.f32.mxu1 %v2451_v55 }
  0xea   :  { %457 = vmatmul.mubr.f32.gmra.mrb[80].mxu0 %v80_v6  ;;  %2213 = vmatmul.mubr.f32.gmra.mrb[80].mxu1 %v2458_v60 }
  0xeb   :  { %462 = vmatprep.mubr.f32.mxu0 %v2404_v0  ;;  %2215 = vmatprep.mubr.f32.mxu1 %v2467_v2 }
  0xee   :  { %463 = vmatmul.mubr.f32.gmra.mrb[82].mxu0 %v81_v8  ;;  %2216 = vmatmul.mubr.f32.gmra.mrb[82].mxu1 %v2475_v7 }
  0xef   :  { %468 = vmatprep.mubr.f32.mxu0 %v2404_v0  ;;  %2218 = vmatprep.mubr.f32.mxu1 %v2483_v12 }
  0xf2   :  { %469 = vmatmul.mubr.f32.gmra.mrb[84].mxu0 %v82_v9  ;;  %2219 = vmatmul.mubr.f32.gmra.mrb[84].mxu1 %v2491_v17 }
  0xf3   :  { %474 = vmatprep.mubr.f32.mxu0 %v2404_v0  ;;  %2221 = vmatprep.mubr.f32.mxu1 %v2499_v22 }
  0xf6   :  { %475 = vmatmul.mubr.f32.gmra.mrb[86].mxu0 %v83_v10  ;;  %2222 = vmatmul.mubr.f32.gmra.mrb[86].mxu1 %v2507_v25 }
  0xf7   :  { %480 = vmatprep.mubr.f32.mxu0 %v2404_v0  ;;  %2224 = vmatprep.mubr.f32.mxu1 %v2515_v27 }
  0xfa   :  { %481 = vmatmul.mubr.f32.gmra.mrb[88].mxu0 %v84_v11  ;;  %2225 = vmatmul.mubr.f32.gmra.mrb[88].mxu1 %v2523_v29 }
  0xfb   :  { %486 = vmatprep.mubr.f32.mxu0 %v2404_v0  ;;  %2227 = vmatprep.mubr.f32.mxu1 %v2529_v31 }
  0xfe   :  { %487 = vmatmul.mubr.f32.gmra.mrb[90].mxu0 %v85_v13  ;;  %2228 = vmatmul.mubr.f32.gmra.mrb[90].mxu1 %v2534_v33 }
  0xff   :  { %492 = vmatprep.mubr.f32.mxu0 %v2404_v0  ;;  %2230 = vmatprep.mubr.f32.mxu1 %v2539_v35 }
 0x102   :  { %493 = vmatmul.mubr.f32.gmra.mrb[92].mxu0 %v86_v14  ;;  %2231 = vmatmul.mubr.f32.gmra.mrb[92].mxu1 %v2544_v37 }
 0x103   :  { %498 = vmatprep.mubr.f32.mxu0 %v2404_v0  ;;  %2233 = vmatprep.mubr.f32.mxu1 %v2549_v39 }
 0x106   :  { %499 = vmatmul.mubr.f32.gmra.mrb[94].mxu0 %v87_v15  ;;  %2234 = vmatmul.mubr.f32.gmra.mrb[94].mxu1 %v2554_v41 }
 0x11d   :  { %v218_v55 = vpop.f32.mrb[0].mxu0  ;;  %v506_v60 = vpop.f32.mrb[0].mxu1 }
 0x11e   :  { %v220_v2 = vpop.f32.mrb[1].mxu0  ;;  %v508_v7 = vpop.f32.mrb[1].mxu1 }
 0x11f   :  { %v1900_v12 = vpack.c.bf16 %v220_v2, %v218_v55  ;;  %v1996_v16 = vpack.c.bf16 %v508_v7, %v506_v60 }
 0x121   :  { %1626 = vst [vmem:[#allocation7] sm:$0xff] %v1900_v12  ;;  %1722 = vst [vmem:[#allocation7 + $0x240] sm:$0xff] %v1996_v16  ;;  %v224_v17 = vpop.f32.mrb[2].mxu0  ;;  %v512_v18 = vpop.f32.mrb[2].mxu1 }
 0x122   :  { %v226_v19 = vpop.f32.mrb[3].mxu0  ;;  %v514_v20 = vpop.f32.mrb[3].mxu1 }
 0x123   :  { %v1902_v21 = vpack.c.bf16 %v226_v19, %v224_v17  ;;  %v1998_v22 = vpack.c.bf16 %v514_v20, %v512_v18 }
 0x125   :  { %1628 = vst [vmem:[#allocation7 + $0xc] sm:$0xff] %v1902_v21  ;;  %1724 = vst [vmem:[#allocation7 + $0x24c] sm:$0xff] %v1998_v22  ;;  %v230_v0 = vpop.f32.mrb[4].mxu0  ;;  %v518_v23 = vpop.f32.mrb[4].mxu1 }
 0x126   :  { %v232_v24 = vpop.f32.mrb[5].mxu0  ;;  %v520_v25 = vpop.f32.mrb[5].mxu1 }
 0x127   :  { %v1904_v26 = vpack.c.bf16 %v232_v24, %v230_v0  ;;  %v2000_v27 = vpack.c.bf16 %v520_v25, %v518_v23 }
 0x129   :  { %1630 = vst [vmem:[#allocation7 + $0x18] sm:$0xff] %v1904_v26  ;;  %1726 = vst [vmem:[#allocation7 + $0x258] sm:$0xff] %v2000_v27  ;;  %v236_v28 = vpop.f32.mrb[6].mxu0  ;;  %v524_v29 = vpop.f32.mrb[6].mxu1 }
 0x12a   :  { %v238_v30 = vpop.f32.mrb[7].mxu0  ;;  %v526_v31 = vpop.f32.mrb[7].mxu1 }
 0x12b   :  { %v1906_v32 = vpack.c.bf16 %v238_v30, %v236_v28  ;;  %v2002_v33 = vpack.c.bf16 %v526_v31, %v524_v29 }
 0x12d   :  { %1632 = vst [vmem:[#allocation7 + $0x24] sm:$0xff] %v1906_v32  ;;  %1728 = vst [vmem:[#allocation7 + $0x264] sm:$0xff] %v2002_v33  ;;  %v242_v34 = vpop.f32.mrb[8].mxu0  ;;  %v530_v35 = vpop.f32.mrb[8].mxu1 }
 0x12e   :  { %v244_v36 = vpop.f32.mrb[9].mxu0  ;;  %v532_v37 = vpop.f32.mrb[9].mxu1 }
 0x12f   :  { %v1908_v38 = vpack.c.bf16 %v244_v36, %v242_v34  ;;  %v2004_v39 = vpack.c.bf16 %v532_v37, %v530_v35 }
 0x131   :  { %1634 = vst [vmem:[#allocation7 + $0x30] sm:$0xff] %v1908_v38  ;;  %1730 = vst [vmem:[#allocation7 + $0x270] sm:$0xff] %v2004_v39  ;;  %v248_v40 = vpop.f32.mrb[10].mxu0  ;;  %v536_v41 = vpop.f32.mrb[10].mxu1 }
 0x132   :  { %v250_v42 = vpop.f32.mrb[11].mxu0  ;;  %v538_v43 = vpop.f32.mrb[11].mxu1 }
 0x133   :  { %v1910_v44 = vpack.c.bf16 %v250_v42, %v248_v40  ;;  %v2006_v45 = vpack.c.bf16 %v538_v43, %v536_v41 }
 0x135   :  { %1636 = vst [vmem:[#allocation7 + $0x3c] sm:$0xff] %v1910_v44  ;;  %1732 = vst [vmem:[#allocation7 + $0x27c] sm:$0xff] %v2006_v45  ;;  %v254_v46 = vpop.f32.mrb[12].mxu0  ;;  %v542_v47 = vpop.f32.mrb[12].mxu1 }
 0x136   :  { %v256_v48 = vpop.f32.mrb[13].mxu0  ;;  %v544_v49 = vpop.f32.mrb[13].mxu1 }
 0x137   :  { %v1912_v50 = vpack.c.bf16 %v256_v48, %v254_v46  ;;  %v2008_v51 = vpack.c.bf16 %v544_v49, %v542_v47 }
 0x139   :  { %1638 = vst [vmem:[#allocation7 + $0x48] sm:$0xff] %v1912_v50  ;;  %1734 = vst [vmem:[#allocation7 + $0x288] sm:$0xff] %v2008_v51  ;;  %v260_v52 = vpop.f32.mrb[14].mxu0  ;;  %v548_v53 = vpop.f32.mrb[14].mxu1 }
 0x13a   :  { %v262_v54 = vpop.f32.mrb[15].mxu0  ;;  %v550_v56 = vpop.f32.mrb[15].mxu1 }
 0x13b   :  { %v1914_v57 = vpack.c.bf16 %v262_v54, %v260_v52  ;;  %v2010_v58 = vpack.c.bf16 %v550_v56, %v548_v53 }
 0x13d   :  { %1640 = vst [vmem:[#allocation7 + $0x54] sm:$0xff] %v1914_v57  ;;  %1736 = vst [vmem:[#allocation7 + $0x294] sm:$0xff] %v2010_v58  ;;  %v266_v59 = vpop.f32.mrb[16].mxu0  ;;  %v554_v61 = vpop.f32.mrb[16].mxu1 }
 0x13e   :  { %v268_v62 = vpop.f32.mrb[17].mxu0  ;;  %v556_v63 = vpop.f32.mrb[17].mxu1 }
 0x13f   :  { %v1916_v1 = vpack.c.bf16 %v268_v62, %v266_v59  ;;  %v2012_v3 = vpack.c.bf16 %v556_v63, %v554_v61 }
 0x141   :  { %1642 = vst [vmem:[#allocation7 + $0x60] sm:$0xff] %v1916_v1  ;;  %1738 = vst [vmem:[#allocation7 + $0x2a0] sm:$0xff] %v2012_v3  ;;  %v272_v4 = vpop.f32.mrb[18].mxu0  ;;  %v560_v5 = vpop.f32.mrb[18].mxu1 }
 0x142   :  { %v274_v6 = vpop.f32.mrb[19].mxu0  ;;  %v562_v8 = vpop.f32.mrb[19].mxu1 }
 0x143   :  { %v1918_v9 = vpack.c.bf16 %v274_v6, %v272_v4  ;;  %v2014_v10 = vpack.c.bf16 %v562_v8, %v560_v5 }
 0x145   :  { %1644 = vst [vmem:[#allocation7 + $0x6c] sm:$0xff] %v1918_v9  ;;  %1740 = vst [vmem:[#allocation7 + $0x2ac] sm:$0xff] %v2014_v10  ;;  %v278_v11 = vpop.f32.mrb[20].mxu0  ;;  %v566_v13 = vpop.f32.mrb[20].mxu1 }
 0x146   :  { %v280_v14 = vpop.f32.mrb[21].mxu0  ;;  %v568_v15 = vpop.f32.mrb[21].mxu1 }
 0x147   :  { %v1920_v55 = vpack.c.bf16 %v280_v14, %v278_v11  ;;  %v2016_v60 = vpack.c.bf16 %v568_v15, %v566_v13 }
 0x149   :  { %1646 = vst [vmem:[#allocation7 + $0x78] sm:$0xff] %v1920_v55  ;;  %1742 = vst [vmem:[#allocation7 + $0x2b8] sm:$0xff] %v2016_v60  ;;  %v284_v2 = vpop.f32.mrb[22].mxu0  ;;  %v572_v7 = vpop.f32.mrb[22].mxu1 }
 0x14a   :  { %v286_v12 = vpop.f32.mrb[23].mxu0  ;;  %v574_v16 = vpop.f32.mrb[23].mxu1 }
 0x14b   :  { %v1922_v17 = vpack.c.bf16 %v286_v12, %v284_v2  ;;  %v2018_v18 = vpack.c.bf16 %v574_v16, %v572_v7 }
 0x14d   :  { %1648 = vst [vmem:[#allocation7 + $0x84] sm:$0xff] %v1922_v17  ;;  %1744 = vst [vmem:[#allocation7 + $0x2c4] sm:$0xff] %v2018_v18  ;;  %v290_v19 = vpop.f32.mrb[24].mxu0  ;;  %v578_v20 = vpop.f32.mrb[24].mxu1 }
 0x14e   :  { %v292_v21 = vpop.f32.mrb[25].mxu0  ;;  %v580_v22 = vpop.f32.mrb[25].mxu1 }
 0x14f   :  { %v1924_v0 = vpack.c.bf16 %v292_v21, %v290_v19  ;;  %v2020_v23 = vpack.c.bf16 %v580_v22, %v578_v20 }
 0x151   :  { %1650 = vst [vmem:[#allocation7 + $0x90] sm:$0xff] %v1924_v0  ;;  %1746 = vst [vmem:[#allocation7 + $0x2d0] sm:$0xff] %v2020_v23  ;;  %v296_v24 = vpop.f32.mrb[26].mxu0  ;;  %v584_v25 = vpop.f32.mrb[26].mxu1 }
 0x152   :  { %v298_v26 = vpop.f32.mrb[27].mxu0  ;;  %v586_v27 = vpop.f32.mrb[27].mxu1 }
 0x153   :  { %v1926_v28 = vpack.c.bf16 %v298_v26, %v296_v24  ;;  %v2022_v29 = vpack.c.bf16 %v586_v27, %v584_v25 }
 0x155   :  { %1652 = vst [vmem:[#allocation7 + $0x9c] sm:$0xff] %v1926_v28  ;;  %1748 = vst [vmem:[#allocation7 + $0x2dc] sm:$0xff] %v2022_v29  ;;  %v302_v30 = vpop.f32.mrb[28].mxu0  ;;  %v590_v31 = vpop.f32.mrb[28].mxu1 }
 0x156   :  { %v304_v32 = vpop.f32.mrb[29].mxu0  ;;  %v592_v33 = vpop.f32.mrb[29].mxu1 }
 0x157   :  { %v1928_v34 = vpack.c.bf16 %v304_v32, %v302_v30  ;;  %v2024_v35 = vpack.c.bf16 %v592_v33, %v590_v31 }
 0x159   :  { %1654 = vst [vmem:[#allocation7 + $0xa8] sm:$0xff] %v1928_v34  ;;  %1750 = vst [vmem:[#allocation7 + $0x2e8] sm:$0xff] %v2024_v35  ;;  %v308_v36 = vpop.f32.mrb[30].mxu0  ;;  %v596_v37 = vpop.f32.mrb[30].mxu1 }
 0x15a   :  { %v310_v38 = vpop.f32.mrb[31].mxu0  ;;  %v598_v39 = vpop.f32.mrb[31].mxu1 }
 0x15b   :  { %v1930_v40 = vpack.c.bf16 %v310_v38, %v308_v36  ;;  %v2026_v41 = vpack.c.bf16 %v598_v39, %v596_v37 }
 0x15d   :  { %1656 = vst [vmem:[#allocation7 + $0xb4] sm:$0xff] %v1930_v40  ;;  %1752 = vst [vmem:[#allocation7 + $0x2f4] sm:$0xff] %v2026_v41  ;;  %v314_v42 = vpop.f32.mrb[32].mxu0  ;;  %v2142_v43 = vpop.f32.mrb[32].mxu1 }
 0x15e   :  { %v1903_v44 = vpack.c.bf16 %v2142_v43, %v2142_v43  ;;  %v316_v45 = vpop.f32.mrb[33].mxu0  ;;  %v667_v46 = vpop.f32.mrb[33].mxu1 }
 0x15f   :  { %v1932_v47 = vpack.c.bf16 %v316_v45, %v314_v42  ;;  %v1901_v48 = vpack.c.bf16 %v667_v46, %v667_v46 }
 0x160   :  { %1629 = vst [vmem:[#allocation7 + $0x14] sm:$0xf] %v1903_v44 }
 0x161   :  { %1658 = vst [vmem:[#allocation7 + $0xc0] sm:$0xff] %v1932_v47  ;;  %1627 = vst [vmem:[#allocation7 + $0x8] sm:$0xf] %v1901_v48  ;;  %v320_v49 = vpop.f32.mrb[34].mxu0  ;;  %v2145_v50 = vpop.f32.mrb[34].mxu1 }
 0x162   :  { %v1907_v51 = vpack.c.bf16 %v2145_v50, %v2145_v50  ;;  %v322_v52 = vpop.f32.mrb[35].mxu0  ;;  %v677_v53 = vpop.f32.mrb[35].mxu1 }
 0x163   :  { %v1934_v54 = vpack.c.bf16 %v322_v52, %v320_v49  ;;  %v1905_v56 = vpack.c.bf16 %v677_v53, %v677_v53 }
 0x164   :  { %1633 = vst [vmem:[#allocation7 + $0x2c] sm:$0xf] %v1907_v51 }
 0x165   :  { %1660 = vst [vmem:[#allocation7 + $0xcc] sm:$0xff] %v1934_v54  ;;  %1631 = vst [vmem:[#allocation7 + $0x20] sm:$0xf] %v1905_v56  ;;  %v326_v57 = vpop.f32.mrb[36].mxu0  ;;  %v2148_v58 = vpop.f32.mrb[36].mxu1 }
 0x166   :  { %v1911_v59 = vpack.c.bf16 %v2148_v58, %v2148_v58  ;;  %v328_v61 = vpop.f32.mrb[37].mxu0  ;;  %v687_v62 = vpop.f32.mrb[37].mxu1 }
 0x167   :  { %v1936_v63 = vpack.c.bf16 %v328_v61, %v326_v57  ;;  %v1909_v1 = vpack.c.bf16 %v687_v62, %v687_v62 }
 0x168   :  { %1637 = vst [vmem:[#allocation7 + $0x44] sm:$0xf] %v1911_v59 }
 0x169   :  { %1662 = vst [vmem:[#allocation7 + $0xd8] sm:$0xff] %v1936_v63  ;;  %1635 = vst [vmem:[#allocation7 + $0x38] sm:$0xf] %v1909_v1  ;;  %v332_v3 = vpop.f32.mrb[38].mxu0  ;;  %v2151_v4 = vpop.f32.mrb[38].mxu1 }
 0x16a   :  { %v1915_v5 = vpack.c.bf16 %v2151_v4, %v2151_v4  ;;  %v334_v6 = vpop.f32.mrb[39].mxu0  ;;  %v697_v8 = vpop.f32.mrb[39].mxu1 }
 0x16b   :  { %v1938_v9 = vpack.c.bf16 %v334_v6, %v332_v3  ;;  %v1913_v10 = vpack.c.bf16 %v697_v8, %v697_v8 }
 0x16c   :  { %1641 = vst [vmem:[#allocation7 + $0x5c] sm:$0xf] %v1915_v5 }
 0x16d   :  { %1664 = vst [vmem:[#allocation7 + $0xe4] sm:$0xff] %v1938_v9  ;;  %1639 = vst [vmem:[#allocation7 + $0x50] sm:$0xf] %v1913_v10  ;;  %v338_v11 = vpop.f32.mrb[40].mxu0  ;;  %v2154_v13 = vpop.f32.mrb[40].mxu1 }
 0x16e   :  { %v1919_v14 = vpack.c.bf16 %v2154_v13, %v2154_v13  ;;  %v340_v15 = vpop.f32.mrb[41].mxu0  ;;  %v707_v55 = vpop.f32.mrb[41].mxu1 }
 0x16f   :  { %v1940_v60 = vpack.c.bf16 %v340_v15, %v338_v11  ;;  %v1917_v2 = vpack.c.bf16 %v707_v55, %v707_v55 }
 0x170   :  { %1645 = vst [vmem:[#allocation7 + $0x74] sm:$0xf] %v1919_v14 }
 0x171   :  { %1666 = vst [vmem:[#allocation7 + $0xf0] sm:$0xff] %v1940_v60  ;;  %1643 = vst [vmem:[#allocation7 + $0x68] sm:$0xf] %v1917_v2  ;;  %v344_v7 = vpop.f32.mrb[42].mxu0  ;;  %v2157_v12 = vpop.f32.mrb[42].mxu1 }
 0x172   :  { %v1923_v16 = vpack.c.bf16 %v2157_v12, %v2157_v12  ;;  %v346_v17 = vpop.f32.mrb[43].mxu0  ;;  %v717_v18 = vpop.f32.mrb[43].mxu1 }
 0x173   :  { %v1942_v19 = vpack.c.bf16 %v346_v17, %v344_v7  ;;  %v1921_v20 = vpack.c.bf16 %v717_v18, %v717_v18 }
 0x174   :  { %1649 = vst [vmem:[#allocation7 + $0x8c] sm:$0xf] %v1923_v16 }
 0x175   :  { %1668 = vst [vmem:[#allocation7 + $0xfc] sm:$0xff] %v1942_v19  ;;  %1647 = vst [vmem:[#allocation7 + $0x80] sm:$0xf] %v1921_v20  ;;  %v350_v21 = vpop.f32.mrb[44].mxu0  ;;  %v2160_v22 = vpop.f32.mrb[44].mxu1 }
 0x176   :  { %v1927_v0 = vpack.c.bf16 %v2160_v22, %v2160_v22  ;;  %v352_v23 = vpop.f32.mrb[45].mxu0  ;;  %v727_v24 = vpop.f32.mrb[45].mxu1 }
 0x177   :  { %v1944_v25 = vpack.c.bf16 %v352_v23, %v350_v21  ;;  %v1925_v26 = vpack.c.bf16 %v727_v24, %v727_v24 }
 0x178   :  { %1653 = vst [vmem:[#allocation7 + $0xa4] sm:$0xf] %v1927_v0 }
 0x179   :  { %1670 = vst [vmem:[#allocation7 + $0x108] sm:$0xff] %v1944_v25  ;;  %1651 = vst [vmem:[#allocation7 + $0x98] sm:$0xf] %v1925_v26  ;;  %v356_v27 = vpop.f32.mrb[46].mxu0  ;;  %v2163_v28 = vpop.f32.mrb[46].mxu1 }
 0x17a   :  { %v1931_v29 = vpack.c.bf16 %v2163_v28, %v2163_v28  ;;  %v358_v30 = vpop.f32.mrb[47].mxu0  ;;  %v737_v31 = vpop.f32.mrb[47].mxu1 }
 0x17b   :  { %v1946_v32 = vpack.c.bf16 %v358_v30, %v356_v27  ;;  %v1929_v33 = vpack.c.bf16 %v737_v31, %v737_v31 }
 0x17c   :  { %1657 = vst [vmem:[#allocation7 + $0xbc] sm:$0xf] %v1931_v29 }
 0x17d   :  { %1672 = vst [vmem:[#allocation7 + $0x114] sm:$0xff] %v1946_v32  ;;  %1655 = vst [vmem:[#allocation7 + $0xb0] sm:$0xf] %v1929_v33  ;;  %v362_v34 = vpop.f32.mrb[48].mxu0  ;;  %v2166_v35 = vpop.f32.mrb[48].mxu1 }
 0x17e   :  { %v1935_v36 = vpack.c.bf16 %v2166_v35, %v2166_v35  ;;  %v364_v37 = vpop.f32.mrb[49].mxu0  ;;  %v747_v38 = vpop.f32.mrb[49].mxu1 }
 0x17f   :  { %v1948_v39 = vpack.c.bf16 %v364_v37, %v362_v34  ;;  %v1933_v40 = vpack.c.bf16 %v747_v38, %v747_v38 }
 0x180   :  { %1661 = vst [vmem:[#allocation7 + $0xd4] sm:$0xf] %v1935_v36 }
 0x181   :  { %1674 = vst [vmem:[#allocation7 + $0x120] sm:$0xff] %v1948_v39  ;;  %1659 = vst [vmem:[#allocation7 + $0xc8] sm:$0xf] %v1933_v40  ;;  %v368_v41 = vpop.f32.mrb[50].mxu0  ;;  %v2169_v42 = vpop.f32.mrb[50].mxu1 }
 0x182   :  { %v1939_v43 = vpack.c.bf16 %v2169_v42, %v2169_v42  ;;  %v370_v44 = vpop.f32.mrb[51].mxu0  ;;  %v757_v45 = vpop.f32.mrb[51].mxu1 }
 0x183   :  { %v1950_v46 = vpack.c.bf16 %v370_v44, %v368_v41  ;;  %v1937_v47 = vpack.c.bf16 %v757_v45, %v757_v45 }
 0x184   :  { %1665 = vst [vmem:[#allocation7 + $0xec] sm:$0xf] %v1939_v43 }
 0x185   :  { %1676 = vst [vmem:[#allocation7 + $0x12c] sm:$0xff] %v1950_v46  ;;  %1663 = vst [vmem:[#allocation7 + $0xe0] sm:$0xf] %v1937_v47  ;;  %v374_v48 = vpop.f32.mrb[52].mxu0  ;;  %v2172_v49 = vpop.f32.mrb[52].mxu1 }
 0x186   :  { %v1943_v50 = vpack.c.bf16 %v2172_v49, %v2172_v49  ;;  %v376_v51 = vpop.f32.mrb[53].mxu0  ;;  %v767_v52 = vpop.f32.mrb[53].mxu1 }
 0x187   :  { %v1952_v53 = vpack.c.bf16 %v376_v51, %v374_v48  ;;  %v1941_v54 = vpack.c.bf16 %v767_v52, %v767_v52 }
 0x188   :  { %1669 = vst [vmem:[#allocation7 + $0x104] sm:$0xf] %v1943_v50 }
 0x189   :  { %1678 = vst [vmem:[#allocation7 + $0x138] sm:$0xff] %v1952_v53  ;;  %1667 = vst [vmem:[#allocation7 + $0xf8] sm:$0xf] %v1941_v54  ;;  %v380_v56 = vpop.f32.mrb[54].mxu0  ;;  %v2175_v57 = vpop.f32.mrb[54].mxu1 }
 0x18a   :  { %v1947_v58 = vpack.c.bf16 %v2175_v57, %v2175_v57  ;;  %v382_v59 = vpop.f32.mrb[55].mxu0  ;;  %v777_v61 = vpop.f32.mrb[55].mxu1 }
 0x18b   :  { %v1954_v62 = vpack.c.bf16 %v382_v59, %v380_v56  ;;  %v1945_v63 = vpack.c.bf16 %v777_v61, %v777_v61 }
 0x18c   :  { %1673 = vst [vmem:[#allocation7 + $0x11c] sm:$0xf] %v1947_v58 }
 0x18d   :  { %1680 = vst [vmem:[#allocation7 + $0x144] sm:$0xff] %v1954_v62  ;;  %1671 = vst [vmem:[#allocation7 + $0x110] sm:$0xf] %v1945_v63  ;;  %v386_v1 = vpop.f32.mrb[56].mxu0  ;;  %v2178_v3 = vpop.f32.mrb[56].mxu1 }
 0x18e   :  { %v1951_v4 = vpack.c.bf16 %v2178_v3, %v2178_v3  ;;  %v388_v5 = vpop.f32.mrb[57].mxu0  ;;  %v787_v6 = vpop.f32.mrb[57].mxu1 }
 0x18f   :  { %v1956_v8 = vpack.c.bf16 %v388_v5, %v386_v1  ;;  %v1949_v9 = vpack.c.bf16 %v787_v6, %v787_v6 }
 0x190   :  { %1677 = vst [vmem:[#allocation7 + $0x134] sm:$0xf] %v1951_v4 }
 0x191   :  { %1682 = vst [vmem:[#allocation7 + $0x150] sm:$0xff] %v1956_v8  ;;  %1675 = vst [vmem:[#allocation7 + $0x128] sm:$0xf] %v1949_v9  ;;  %v392_v10 = vpop.f32.mrb[58].mxu0  ;;  %v2181_v11 = vpop.f32.mrb[58].mxu1 }
 0x192   :  { %v1955_v13 = vpack.c.bf16 %v2181_v11, %v2181_v11  ;;  %v394_v14 = vpop.f32.mrb[59].mxu0  ;;  %v797_v15 = vpop.f32.mrb[59].mxu1 }
 0x193   :  { %v1958_v55 = vpack.c.bf16 %v394_v14, %v392_v10  ;;  %v1953_v60 = vpack.c.bf16 %v797_v15, %v797_v15 }
 0x194   :  { %1681 = vst [vmem:[#allocation7 + $0x14c] sm:$0xf] %v1955_v13 }
 0x195   :  { %1684 = vst [vmem:[#allocation7 + $0x15c] sm:$0xff] %v1958_v55  ;;  %1679 = vst [vmem:[#allocation7 + $0x140] sm:$0xf] %v1953_v60  ;;  %v398_v2 = vpop.f32.mrb[60].mxu0  ;;  %v2184_v7 = vpop.f32.mrb[60].mxu1 }
 0x196   :  { %v1959_v12 = vpack.c.bf16 %v2184_v7, %v2184_v7  ;;  %v400_v16 = vpop.f32.mrb[61].mxu0  ;;  %v807_v17 = vpop.f32.mrb[61].mxu1 }
 0x197   :  { %v1960_v18 = vpack.c.bf16 %v400_v16, %v398_v2  ;;  %v1957_v19 = vpack.c.bf16 %v807_v17, %v807_v17 }
 0x198   :  { %1685 = vst [vmem:[#allocation7 + $0x164] sm:$0xf] %v1959_v12 }
 0x199   :  { %1686 = vst [vmem:[#allocation7 + $0x168] sm:$0xff] %v1960_v18  ;;  %1683 = vst [vmem:[#allocation7 + $0x158] sm:$0xf] %v1957_v19  ;;  %v404_v20 = vpop.f32.mrb[62].mxu0  ;;  %v2187_v21 = vpop.f32.mrb[62].mxu1 }
 0x19a   :  { %v1963_v22 = vpack.c.bf16 %v2187_v21, %v2187_v21  ;;  %v406_v0 = vpop.f32.mrb[63].mxu0  ;;  %v817_v23 = vpop.f32.mrb[63].mxu1 }
 0x19b   :  { %v1962_v24 = vpack.c.bf16 %v406_v0, %v404_v20  ;;  %v1961_v25 = vpack.c.bf16 %v817_v23, %v817_v23 }
 0x19c   :  { %1689 = vst [vmem:[#allocation7 + $0x17c] sm:$0xf] %v1963_v22 }
 0x19d   :  { %1688 = vst [vmem:[#allocation7 + $0x174] sm:$0xff] %v1962_v24  ;;  %1687 = vst [vmem:[#allocation7 + $0x170] sm:$0xf] %v1961_v25  ;;  %v410_v26 = vpop.f32.mrb[64].mxu0  ;;  %v2190_v27 = vpop.f32.mrb[64].mxu1 }
 0x19e   :  { %v1967_v28 = vpack.c.bf16 %v2190_v27, %v2190_v27  ;;  %v412_v29 = vpop.f32.mrb[65].mxu0  ;;  %v827_v30 = vpop.f32.mrb[65].mxu1 }
 0x19f   :  { %v1964_v31 = vpack.c.bf16 %v412_v29, %v410_v26  ;;  %v1965_v32 = vpack.c.bf16 %v827_v30, %v827_v30 }
 0x1a0   :  { %1693 = vst [vmem:[#allocation7 + $0x194] sm:$0xf] %v1967_v28 }
 0x1a1   :  { %1690 = vst [vmem:[#allocation7 + $0x180] sm:$0xff] %v1964_v31  ;;  %1691 = vst [vmem:[#allocation7 + $0x188] sm:$0xf] %v1965_v32  ;;  %v416_v33 = vpop.f32.mrb[66].mxu0  ;;  %v2193_v34 = vpop.f32.mrb[66].mxu1 }
 0x1a2   :  { %v1971_v35 = vpack.c.bf16 %v2193_v34, %v2193_v34  ;;  %v418_v36 = vpop.f32.mrb[67].mxu0  ;;  %v837_v37 = vpop.f32.mrb[67].mxu1 }
 0x1a3   :  { %v1966_v38 = vpack.c.bf16 %v418_v36, %v416_v33  ;;  %v1969_v39 = vpack.c.bf16 %v837_v37, %v837_v37 }
 0x1a4   :  { %1697 = vst [vmem:[#allocation7 + $0x1ac] sm:$0xf] %v1971_v35 }
 0x1a5   :  { %1692 = vst [vmem:[#allocation7 + $0x18c] sm:$0xff] %v1966_v38  ;;  %1695 = vst [vmem:[#allocation7 + $0x1a0] sm:$0xf] %v1969_v39  ;;  %v422_v40 = vpop.f32.mrb[68].mxu0  ;;  %v2196_v41 = vpop.f32.mrb[68].mxu1 }
 0x1a6   :  { %v1975_v42 = vpack.c.bf16 %v2196_v41, %v2196_v41  ;;  %v424_v43 = vpop.f32.mrb[69].mxu0  ;;  %v847_v44 = vpop.f32.mrb[69].mxu1 }
 0x1a7   :  { %v1968_v45 = vpack.c.bf16 %v424_v43, %v422_v40  ;;  %v1973_v46 = vpack.c.bf16 %v847_v44, %v847_v44 }
 0x1a8   :  { %1701 = vst [vmem:[#allocation7 + $0x1c4] sm:$0xf] %v1975_v42 }
 0x1a9   :  { %1694 = vst [vmem:[#allocation7 + $0x198] sm:$0xff] %v1968_v45  ;;  %1699 = vst [vmem:[#allocation7 + $0x1b8] sm:$0xf] %v1973_v46  ;;  %v428_v47 = vpop.f32.mrb[70].mxu0  ;;  %v2199_v48 = vpop.f32.mrb[70].mxu1 }
 0x1aa   :  { %v1979_v49 = vpack.c.bf16 %v2199_v48, %v2199_v48  ;;  %v430_v50 = vpop.f32.mrb[71].mxu0  ;;  %v857_v51 = vpop.f32.mrb[71].mxu1 }
 0x1ab   :  { %v1970_v52 = vpack.c.bf16 %v430_v50, %v428_v47  ;;  %v1977_v53 = vpack.c.bf16 %v857_v51, %v857_v51 }
 0x1ac   :  { %1705 = vst [vmem:[#allocation7 + $0x1dc] sm:$0xf] %v1979_v49 }
 0x1ad   :  { %1696 = vst [vmem:[#allocation7 + $0x1a4] sm:$0xff] %v1970_v52  ;;  %1703 = vst [vmem:[#allocation7 + $0x1d0] sm:$0xf] %v1977_v53  ;;  %v434_v54 = vpop.f32.mrb[72].mxu0  ;;  %v2202_v56 = vpop.f32.mrb[72].mxu1 }
 0x1ae   :  { %v1983_v57 = vpack.c.bf16 %v2202_v56, %v2202_v56  ;;  %v436_v58 = vpop.f32.mrb[73].mxu0  ;;  %v867_v59 = vpop.f32.mrb[73].mxu1 }
 0x1af   :  { %v1972_v61 = vpack.c.bf16 %v436_v58, %v434_v54  ;;  %v1981_v62 = vpack.c.bf16 %v867_v59, %v867_v59 }
 0x1b0   :  { %1709 = vst [vmem:[#allocation7 + $0x1f4] sm:$0xf] %v1983_v57 }
 0x1b1   :  { %1698 = vst [vmem:[#allocation7 + $0x1b0] sm:$0xff] %v1972_v61  ;;  %1707 = vst [vmem:[#allocation7 + $0x1e8] sm:$0xf] %v1981_v62  ;;  %v440_v63 = vpop.f32.mrb[74].mxu0  ;;  %v2205_v1 = vpop.f32.mrb[74].mxu1 }
 0x1b2   :  { %v1987_v3 = vpack.c.bf16 %v2205_v1, %v2205_v1  ;;  %v442_v4 = vpop.f32.mrb[75].mxu0  ;;  %v877_v5 = vpop.f32.mrb[75].mxu1 }
 0x1b3   :  { %v1974_v6 = vpack.c.bf16 %v442_v4, %v440_v63  ;;  %v1985_v8 = vpack.c.bf16 %v877_v5, %v877_v5 }
 0x1b4   :  { %1713 = vst [vmem:[#allocation7 + $0x20c] sm:$0xf] %v1987_v3 }
 0x1b5   :  { %1700 = vst [vmem:[#allocation7 + $0x1bc] sm:$0xff] %v1974_v6  ;;  %1711 = vst [vmem:[#allocation7 + $0x200] sm:$0xf] %v1985_v8  ;;  %v446_v9 = vpop.f32.mrb[76].mxu0  ;;  %v2208_v10 = vpop.f32.mrb[76].mxu1 }
 0x1b6   :  { %v1991_v11 = vpack.c.bf16 %v2208_v10, %v2208_v10  ;;  %v448_v13 = vpop.f32.mrb[77].mxu0  ;;  %v887_v14 = vpop.f32.mrb[77].mxu1 }
 0x1b7   :  { %v1976_v15 = vpack.c.bf16 %v448_v13, %v446_v9  ;;  %v1989_v55 = vpack.c.bf16 %v887_v14, %v887_v14 }
 0x1b8   :  { %1717 = vst [vmem:[#allocation7 + $0x224] sm:$0xf] %v1991_v11 }
 0x1b9   :  { %1702 = vst [vmem:[#allocation7 + $0x1c8] sm:$0xff] %v1976_v15  ;;  %1715 = vst [vmem:[#allocation7 + $0x218] sm:$0xf] %v1989_v55  ;;  %v452_v60 = vpop.f32.mrb[78].mxu0  ;;  %v2211_v2 = vpop.f32.mrb[78].mxu1 }
 0x1ba   :  { %v1995_v7 = vpack.c.bf16 %v2211_v2, %v2211_v2  ;;  %v454_v12 = vpop.f32.mrb[79].mxu0  ;;  %v897_v16 = vpop.f32.mrb[79].mxu1 }
 0x1bb   :  { %v1978_v17 = vpack.c.bf16 %v454_v12, %v452_v60  ;;  %v1993_v18 = vpack.c.bf16 %v897_v16, %v897_v16 }
 0x1bc   :  { %1721 = vst [vmem:[#allocation7 + $0x23c] sm:$0xf] %v1995_v7 }
 0x1bd   :  { %1704 = vst [vmem:[#allocation7 + $0x1d4] sm:$0xff] %v1978_v17  ;;  %1719 = vst [vmem:[#allocation7 + $0x230] sm:$0xf] %v1993_v18  ;;  %v458_v19 = vpop.f32.mrb[80].mxu0  ;;  %v2214_v20 = vpop.f32.mrb[80].mxu1 }
 0x1be   :  { %v1999_v21 = vpack.c.bf16 %v2214_v20, %v2214_v20  ;;  %v460_v22 = vpop.f32.mrb[81].mxu0  ;;  %v907_v0 = vpop.f32.mrb[81].mxu1 }
 0x1bf   :  { %v1980_v23 = vpack.c.bf16 %v460_v22, %v458_v19  ;;  %v1997_v24 = vpack.c.bf16 %v907_v0, %v907_v0 }
 0x1c0   :  { %1725 = vst [vmem:[#allocation7 + $0x254] sm:$0xf] %v1999_v21 }
 0x1c1   :  { %1706 = vst [vmem:[#allocation7 + $0x1e0] sm:$0xff] %v1980_v23  ;;  %1723 = vst [vmem:[#allocation7 + $0x248] sm:$0xf] %v1997_v24  ;;  %v464_v25 = vpop.f32.mrb[82].mxu0  ;;  %v2217_v26 = vpop.f32.mrb[82].mxu1 }
 0x1c2   :  { %v2003_v27 = vpack.c.bf16 %v2217_v26, %v2217_v26  ;;  %v466_v28 = vpop.f32.mrb[83].mxu0  ;;  %v917_v29 = vpop.f32.mrb[83].mxu1 }
 0x1c3   :  { %v1982_v30 = vpack.c.bf16 %v466_v28, %v464_v25  ;;  %v2001_v31 = vpack.c.bf16 %v917_v29, %v917_v29 }
 0x1c4   :  { %1729 = vst [vmem:[#allocation7 + $0x26c] sm:$0xf] %v2003_v27 }
 0x1c5   :  { %1708 = vst [vmem:[#allocation7 + $0x1ec] sm:$0xff] %v1982_v30  ;;  %1727 = vst [vmem:[#allocation7 + $0x260] sm:$0xf] %v2001_v31  ;;  %v470_v32 = vpop.f32.mrb[84].mxu0  ;;  %v2220_v33 = vpop.f32.mrb[84].mxu1 }
 0x1c6   :  { %v2007_v34 = vpack.c.bf16 %v2220_v33, %v2220_v33  ;;  %v472_v35 = vpop.f32.mrb[85].mxu0  ;;  %v927_v36 = vpop.f32.mrb[85].mxu1 }
 0x1c7   :  { %v1984_v37 = vpack.c.bf16 %v472_v35, %v470_v32  ;;  %v2005_v38 = vpack.c.bf16 %v927_v36, %v927_v36 }
 0x1c8   :  { %1733 = vst [vmem:[#allocation7 + $0x284] sm:$0xf] %v2007_v34 }
 0x1c9   :  { %1710 = vst [vmem:[#allocation7 + $0x1f8] sm:$0xff] %v1984_v37  ;;  %1731 = vst [vmem:[#allocation7 + $0x278] sm:$0xf] %v2005_v38  ;;  %v476_v39 = vpop.f32.mrb[86].mxu0  ;;  %v2223_v40 = vpop.f32.mrb[86].mxu1 }
 0x1ca   :  { %v2011_v41 = vpack.c.bf16 %v2223_v40, %v2223_v40  ;;  %v478_v42 = vpop.f32.mrb[87].mxu0  ;;  %v937_v43 = vpop.f32.mrb[87].mxu1 }
 0x1cb   :  { %v1986_v44 = vpack.c.bf16 %v478_v42, %v476_v39  ;;  %v2009_v45 = vpack.c.bf16 %v937_v43, %v937_v43 }
 0x1cc   :  { %1737 = vst [vmem:[#allocation7 + $0x29c] sm:$0xf] %v2011_v41 }
 0x1cd   :  { %1712 = vst [vmem:[#allocation7 + $0x204] sm:$0xff] %v1986_v44  ;;  %1735 = vst [vmem:[#allocation7 + $0x290] sm:$0xf] %v2009_v45  ;;  %v482_v46 = vpop.f32.mrb[88].mxu0  ;;  %v2226_v47 = vpop.f32.mrb[88].mxu1 }
 0x1ce   :  { %v2015_v48 = vpack.c.bf16 %v2226_v47, %v2226_v47  ;;  %v484_v49 = vpop.f32.mrb[89].mxu0  ;;  %v947_v50 = vpop.f32.mrb[89].mxu1 }
 0x1cf   :  { %v1988_v51 = vpack.c.bf16 %v484_v49, %v482_v46  ;;  %v2013_v52 = vpack.c.bf16 %v947_v50, %v947_v50 }
 0x1d0   :  { %1741 = vst [vmem:[#allocation7 + $0x2b4] sm:$0xf] %v2015_v48 }
 0x1d1   :  { %1714 = vst [vmem:[#allocation7 + $0x210] sm:$0xff] %v1988_v51  ;;  %1739 = vst [vmem:[#allocation7 + $0x2a8] sm:$0xf] %v2013_v52  ;;  %v488_v53 = vpop.f32.mrb[90].mxu0  ;;  %v2229_v54 = vpop.f32.mrb[90].mxu1 }
 0x1d2   :  { %v2019_v56 = vpack.c.bf16 %v2229_v54, %v2229_v54  ;;  %v490_v57 = vpop.f32.mrb[91].mxu0  ;;  %v957_v58 = vpop.f32.mrb[91].mxu1 }
 0x1d3   :  { %v1990_v59 = vpack.c.bf16 %v490_v57, %v488_v53  ;;  %v2017_v61 = vpack.c.bf16 %v957_v58, %v957_v58 }
 0x1d4   :  { %1745 = vst [vmem:[#allocation7 + $0x2cc] sm:$0xf] %v2019_v56 }
 0x1d5   :  { %1716 = vst [vmem:[#allocation7 + $0x21c] sm:$0xff] %v1990_v59  ;;  %1743 = vst [vmem:[#allocation7 + $0x2c0] sm:$0xf] %v2017_v61  ;;  %v494_v62 = vpop.f32.mrb[92].mxu0  ;;  %v2232_v63 = vpop.f32.mrb[92].mxu1 }
 0x1d6   :  { %v2023_v1 = vpack.c.bf16 %v2232_v63, %v2232_v63  ;;  %v496_v3 = vpop.f32.mrb[93].mxu0  ;;  %v967_v4 = vpop.f32.mrb[93].mxu1 }
 0x1d7   :  { %v1992_v5 = vpack.c.bf16 %v496_v3, %v494_v62  ;;  %v2021_v6 = vpack.c.bf16 %v967_v4, %v967_v4 }
 0x1d8   :  { %1749 = vst [vmem:[#allocation7 + $0x2e4] sm:$0xf] %v2023_v1 }
 0x1d9   :  { %1718 = vst [vmem:[#allocation7 + $0x228] sm:$0xff] %v1992_v5  ;;  %1747 = vst [vmem:[#allocation7 + $0x2d8] sm:$0xf] %v2021_v6  ;;  %v500_v8 = vpop.f32.mrb[94].mxu0  ;;  %v2235_v9 = vpop.f32.mrb[94].mxu1 }
 0x1da   :  { %v2027_v10 = vpack.c.bf16 %v2235_v9, %v2235_v9  ;;  %v502_v11 = vpop.f32.mrb[95].mxu0  ;;  %v977_v13 = vpop.f32.mrb[95].mxu1 }
 0x1db   :  { %v1994_v14 = vpack.c.bf16 %v502_v11, %v500_v8  ;;  %v2025_v15 = vpack.c.bf16 %v977_v13, %v977_v13 }
 0x1dc   :  { %1753 = vst [vmem:[#allocation7 + $0x2fc] sm:$0xf] %v2027_v10 }
 0x1dd   :  { %1720 = vst [vmem:[#allocation7 + $0x234] sm:$0xff] %v1994_v14  ;;  %1751 = vst [vmem:[#allocation7 + $0x2f0] sm:$0xf] %v2025_v15 }
 0x1de   :  { %2381 = shalt.err (!%p2378_p6)
}
 0x1df   :  { %s2382_s12 = scalar_lea.hbm %s2629_s2, 12288 }
 0x1e0   :  { %p2383_p7 = scmp.ne.s32.totalorder %s2629_s2, %s2382_s12  ;;  %p2386_p8 = scmp.lt.u32.totalorder %s2382_s12, %s2629_s2 }
 0x1e2   :  { %p2388_p9 = pnand %p2386_p8, %p2383_p7 }
 0x1e4   :  { %2391 = shalt.err (!%p2388_p9)
}
 0x1e5   :  { %s2406_s17 = smov 192   ;;  %s2407_s18 = smov 12  }
 0x1e6   :  { %1765 = dma.vmem_to_hbm [thread:$0]  %s1760_s8, 12288, %s2629_s2, [#allocation4], %s2406_s17, %s2406_s17, %s2407_s18  }
 0x1e7   :  { %2396 = dma.done.wait [#allocation4], 12288  }
 0x1e8   :  { %2397 = vsyncadd [#allocation4], 4294955008 }
 0x1e9   :  { %1769 = vsyncpa [#allocation3], 1 }
 0x1ea   :  { %1770 = vsyncpa [#allocation6], 1 }
 0x1eb   :  { %1771 = vsyncpa [#allocation4], 1 }

</bundles_post_ra>
